<compile_context>
chip_gen: v5e
topology: v5e:2x2
jax: 0.10.0
libtpu: 0.0.40
codegen_flags: <defaults>
</compile_context>

<pallas_src>
import functools

import jax
import jax.numpy as jnp
from jax.experimental import pallas as pl
from jax.experimental.pallas import tpu as pltpu


def _scalenet_conv_kernel(xs_ref, halo_ref, w_ref, b_ref, a_ref, o_ref, acc_ref,
                          *, tile_h, Wp, C3):
    """3x3 conv + bias + PReLU for one (tile_h, Wp) row band of one image.

    xs_ref  : (1, tile_h, Wp, 3C) bf16  dw-pre-shifted band (no dh halo rows)
    halo_ref: (1, 1, 2, Wp, 3C)   bf16  [row above band, row below band] (zeros at image edge)
    w_ref   : (3, 3C, Co)         bf16  per-dh weight matrix, K index = dw*C + ci
    b_ref   : (1, Co)             f32   conv bias
    a_ref   : (1, 1)              f32   shared PReLU slope (SMEM scalar)
    o_ref   : (1, 1, m, Co)       bf16  conv+bias+PReLU output, row index = h*Wp + w
    acc_ref : (m, Co)             f32   accumulator scratch
    """
    m = tile_h * Wp

    # dh=1 (center rows): one K=3C matmul over the whole band, f32 accumulate.
    x_c = xs_ref[0, :, :, :]                                     # (tile_h, Wp, 3C)
    acc_ref[...] = jnp.dot(x_c.reshape(m, C3), w_ref[1, :, :],
                           preferred_element_type=jnp.float32)

    # dh=0 / dh=2 (rows shifted by +-1): leading-dim slices of the same band (free reshapes).
    if tile_h > 1:
        x_u = xs_ref[0, :tile_h - 1, :, :]                       # rows 0..tile_h-2
        acc_ref[Wp:, :] += jnp.dot(x_u.reshape(m - Wp, C3), w_ref[0, :, :],
                                   preferred_element_type=jnp.float32)
        x_d = xs_ref[0, 1:, :, :]                                # rows 1..tile_h-1
        acc_ref[:m - Wp, :] += jnp.dot(x_d.reshape(m - Wp, C3), w_ref[2, :, :],
                                       preferred_element_type=jnp.float32)

    # Band-boundary rows come from the tiny 2-row halo input.
    acc_ref[:Wp, :] += jnp.dot(halo_ref[0, 0, 0, :, :], w_ref[0, :, :],
                               preferred_element_type=jnp.float32)
    acc_ref[m - Wp:, :] += jnp.dot(halo_ref[0, 0, 1, :, :], w_ref[2, :, :],
                                   preferred_element_type=jnp.float32)

    # Bias + PReLU (single shared slope commutes with PixelShuffle); store bf16.
    res = acc_ref[...] + b_ref[...]
    a = a_ref[0, 0]
    o_ref[0, 0, :, :] = jnp.where(res >= 0.0, res, a * res).astype(o_ref.dtype)


def _choose_tile_h(N, H, Wp, target_m=2048):
    """Band height so m = tile_h*Wp ~ 512-2048, with >=2 grid steps for megacore."""
    th = min(H, max(min(4, H), target_m // Wp))
    n_tiles = -(-H // th)
    if N * n_tiles < 2 and H >= 2:          # keep both v7x TensorCores busy at batch 1
        th = -(-H // 2)
    return th


def scalenet_forward(x_nchw, weight_oihw, bias, prelu_a, scale):
    """Forward pass of ScaleNet.

    x_nchw      : (N, ic, H, W)           float32, NCHW like PyTorch
    weight_oihw : (ic*scale^2, ic, 3, 3)  conv weight, PyTorch OIHW
    bias        : (ic*scale^2,)
    prelu_a     : scalar (single shared PReLU slope)
    returns     : (N, ic, H*scale, W*scale)  NCHW float32
    """
    N, C, H, W = x_nchw.shape
    Co = weight_oihw.shape[0]
    r = scale
    assert Co == C * r * r, "conv out_channels must be ic * scale^2"

    Wp = ((W + 7) // 8) * 8                 # lane/sublane-friendly width
    tile_h = _choose_tile_h(N, H, Wp)
    n_tiles = -(-H // tile_h)
    Hp = n_tiles * tile_h                   # H padded to a tile multiple (no tile_h=H fallback)
    m = tile_h * Wp
    C3 = 3 * C

    # ---- input prep: NCHW->NHWC, cast bf16, pad H->Hp / W->Wp with zeros, conv W-pad,
    #      then concat the dw=0/1/2 shifts on the channel axis (last dim = 3C).
    x_nhwc = jnp.transpose(x_nchw, (0, 2, 3, 1)).astype(jnp.bfloat16)        # (N,H,W,C)
    xpad = jnp.pad(x_nhwc, ((0, 0), (0, Hp - H), (0, Wp - W), (0, 0)))       # (N,Hp,Wp,C)
    xw = jnp.pad(xpad, ((0, 0), (0, 0), (1, 1), (0, 0)))                     # (N,Hp,Wp+2,C)
    xs = jnp.concatenate([xw[:, :, d:d + Wp, :] for d in range(3)], axis=-1)  # (N,Hp,Wp,3C)

    # ---- tiny per-band dh halo: row above / below each band (zeros reproduce conv H padding).
    zrow = jnp.zeros((N, 1, Wp, C3), xs.dtype)
    tops = jnp.concatenate([zrow, xs[:, tile_h - 1:Hp - 1:tile_h]], axis=1)  # (N,n_tiles,Wp,3C)
    bots = jnp.concatenate([xs[:, tile_h:Hp:tile_h], zrow], axis=1)          # (N,n_tiles,Wp,3C)
    halos = jnp.stack([tops, bots], axis=2)                                  # (N,n_tiles,2,Wp,3C)

    # ---- weights: OIHW -> (dh, dw*C + ci, Co) bf16; bias f32; PReLU slope SMEM scalar.
    w_mats = jnp.transpose(weight_oihw, (2, 3, 1, 0)).reshape(3, C3, Co).astype(jnp.bfloat16)
    b2 = bias.reshape(1, Co).astype(jnp.float32)
    a2 = jnp.asarray(prelu_a, jnp.float32).reshape(1, 1)

    kernel = functools.partial(_scalenet_conv_kernel, tile_h=tile_h, Wp=Wp, C3=C3)

    flops = 2 * N * n_tiles * m * (9 * C) * Co
    bytes_accessed = ((xs.size + halos.size + w_mats.size) * 2
                      + b2.size * 4 + a2.size * 4
                      + N * n_tiles * m * Co * 2)

    conv_out = pl.pallas_call(
        kernel,
        out_shape=jax.ShapeDtypeStruct((N, n_tiles, m, Co), jnp.bfloat16),
        grid_spec=pltpu.PrefetchScalarGridSpec(
            num_scalar_prefetch=0,
            grid=(N, n_tiles),
            in_specs=[
                pl.BlockSpec((1, tile_h, Wp, C3), lambda n, i: (n, i, 0, 0)),      # band
                pl.BlockSpec((1, 1, 2, Wp, C3), lambda n, i: (n, i, 0, 0, 0)),     # halo rows
                pl.BlockSpec((3, C3, Co), lambda n, i: (0, 0, 0)),                 # resident W
                pl.BlockSpec((1, Co), lambda n, i: (0, 0)),                        # resident bias
                pl.BlockSpec(memory_space=pltpu.MemorySpace.SMEM),                 # PReLU slope
            ],
            out_specs=pl.BlockSpec((1, 1, m, Co), lambda n, i: (n, i, 0, 0)),
            scratch_shapes=[pltpu.VMEM((m, Co), jnp.float32)],                     # f32 acc
        ),
        compiler_params=pltpu.CompilerParams(
            dimension_semantics=("parallel", "parallel"),
            vmem_limit_bytes=48 * 1024 * 1024,          # fits v7x's 64 MiB with headroom
        ),
        cost_estimate=pl.CostEstimate(
            flops=flops, transcendentals=0, bytes_accessed=bytes_accessed),
    )(xs, halos, w_mats, b2, a2)

    # (N, n_tiles, tile_h*Wp, Co) -> (N, Hp, Wp, Co) (free dim merge), crop padding,
    # then PixelShuffle + NHWC->NCHW as ONE fused XLA transpose (bf16 read, f32 write).
    conv_nhwc = conv_out.reshape(N, Hp, Wp, Co)[:, :H, :W, :]
    y = conv_nhwc.reshape(N, H, W, C, r, r)
    y = jnp.transpose(y, (0, 3, 1, 4, 2, 5)).reshape(N, C, H * r, W * r)
    return y.astype(jnp.float32)


def _reference_forward(x_nchw, weight_oihw, bias, prelu_a, scale):
    """Pure-JAX reference (lax conv) for correctness checking."""
    conv = jax.lax.conv_general_dilated(
        x_nchw, weight_oihw,
        window_strides=(1, 1), padding=((1, 1), (1, 1)),
        dimension_numbers=("NCHW", "OIHW", "NCHW"),
        precision=jax.lax.Precision.HIGHEST,
    )
    conv = conv + bias.reshape(1, -1, 1, 1)
    N, C4, H, W = conv.shape
    r = scale
    ic = C4 // (r * r)
    y = conv.reshape(N, ic, r, r, H, W)
    y = jnp.transpose(y, (0, 1, 4, 2, 5, 3)).reshape(N, ic, H * r, W * r)
    return jnp.where(y >= 0, y, prelu_a * y)


if __name__ == "__main__":
    # Small shapes consistent with the module: batch=2, ic=4, spatial=16, scale=2.
    batch, ic, H, W, scale = 2, 4, 16, 16, 2
    Co = ic * scale * scale

    key = jax.random.PRNGKey(0)
    kx, kw, kb = jax.random.split(key, 3)
    x = jax.random.normal(kx, (batch, ic, H, W), jnp.float32)
    weight = jax.random.normal(kw, (Co, ic, 3, 3), jnp.float32) * 0.1
    bias = jax.random.normal(kb, (Co,), jnp.float32) * 0.1
    prelu_a = jnp.float32(0.25)  # PyTorch PReLU default init

    out = jax.block_until_ready(scalenet_forward(x, weight, bias, prelu_a, scale))
    assert out.shape == (batch, ic, H * scale, W * scale)

    # Kernel feeds the MXU bf16 activations/weights (f32 accumulation) and writes a bf16
    # conv result, so compare against a reference on bf16-rounded inputs with a tolerance
    # covering the final bf16 rounding of the conv output.
    x_bf = x.astype(jnp.bfloat16).astype(jnp.float32)
    w_bf = weight.astype(jnp.bfloat16).astype(jnp.float32)
    ref = _reference_forward(x_bf, w_bf, bias, prelu_a, scale)
    assert jnp.allclose(out, ref, atol=2e-2, rtol=2e-2), \
        float(jnp.max(jnp.abs(out - ref)))

    print("KERNEL_OK")
</pallas_src>

<mosaic_0001>
module attributes {stable_mosaic.version = 11 : i64} {
  func.func @_scalenet_conv_kernel(%arg0: i32, %arg1: i32, %arg2: memref<1x16x16x12xbf16, #tpu.memory_space<vmem>>, %arg3: memref<1x1x2x16x12xbf16, #tpu.memory_space<vmem>>, %arg4: memref<3x12x16xbf16, #tpu.memory_space<vmem>>, %arg5: memref<1x16xf32, #tpu.memory_space<vmem>>, %arg6: memref<1x1xf32, #tpu.memory_space<smem>>, %arg7: memref<1x1x256x16xbf16, #tpu.memory_space<vmem>>, %arg8: memref<256x16xf32, #tpu.memory_space<vmem>>) attributes {dimension_semantics = [#tpu.dimension_semantics<parallel>, #tpu.dimension_semantics<parallel>], iteration_bounds = array<i64: 2, 1>, scalar_prefetch = 0 : i64, scratch_operands = 1 : i64, tpu.core_type = #tpu.core_type<tc>, window_params = [{transform_indices = @transform_0, window_bounds = array<i64: 1, 16, 16, 12>}, {transform_indices = @transform_1, window_bounds = array<i64: 1, 1, 2, 16, 12>}, {pipeline_mode = #tpu.pipeline_mode<synchronous>, transform_indices = @transform_2, window_bounds = array<i64: 3, 12, 16>}, {pipeline_mode = #tpu.pipeline_mode<synchronous>, transform_indices = @transform_3, window_bounds = array<i64: 1, 16>}, {transform_indices = @transform_4, window_bounds = array<i64: 1, 1>}, {transform_indices = @transform_5, window_bounds = array<i64: 1, 1, 256, 16>}]} {
    %c0 = arith.constant 0 : index
    %c0_0 = arith.constant 0 : index
    %c0_1 = arith.constant 0 : index
    %c0_2 = arith.constant 0 : index
    %0 = vector.load %arg2[%c0, %c0_0, %c0_1, %c0_2] : memref<1x16x16x12xbf16, #tpu.memory_space<vmem>>, vector<1x16x16x12xbf16>
    %1 = vector.shape_cast %0 : vector<1x16x16x12xbf16> to vector<16x16x12xbf16>
    %2 = vector.shape_cast %1 : vector<16x16x12xbf16> to vector<256x12xbf16>
    %c1 = arith.constant 1 : index
    %c0_3 = arith.constant 0 : index
    %c0_4 = arith.constant 0 : index
    %3 = vector.load %arg4[%c1, %c0_3, %c0_4] : memref<3x12x16xbf16, #tpu.memory_space<vmem>>, vector<1x12x16xbf16>
    %4 = vector.shape_cast %3 : vector<1x12x16xbf16> to vector<12x16xbf16>
    %cst = arith.constant dense<0.000000e+00> : vector<256x16xf32>
    %5 = tpu.matmul %2, %4, %cst {dimension_numbers = #tpu.dot_dimension_numbers<[1], [0], [0], [1], [0, 0, 1, 1], [], []>} : vector<256x12xbf16>, vector<12x16xbf16>, vector<256x16xf32> -> vector<256x16xf32>
    %c0_5 = arith.constant 0 : index
    %c0_6 = arith.constant 0 : index
    %6 = vector.load %arg8[%c0_5, %c0_6] : memref<256x16xf32, #tpu.memory_space<vmem>>, vector<256x16xf32>
    tpu.vector_store %arg8[%c0_5, %c0_6], %5 {strides = array<i32>} : memref<256x16xf32, #tpu.memory_space<vmem>>, vector<256x16xf32>,
    %c0_7 = arith.constant 0 : index
    %c0_8 = arith.constant 0 : index
    %c0_9 = arith.constant 0 : index
    %c0_10 = arith.constant 0 : index
    %7 = vector.load %arg2[%c0_7, %c0_8, %c0_9, %c0_10] : memref<1x16x16x12xbf16, #tpu.memory_space<vmem>>, vector<1x15x16x12xbf16>
    %8 = vector.shape_cast %7 : vector<1x15x16x12xbf16> to vector<15x16x12xbf16>
    %c16 = arith.constant 16 : index
    %c0_11 = arith.constant 0 : index
    %9 = vector.load %arg8[%c16, %c0_11] : memref<256x16xf32, #tpu.memory_space<vmem>>, vector<240x16xf32>
    %10 = vector.shape_cast %8 : vector<15x16x12xbf16> to vector<240x12xbf16>
    %c0_12 = arith.constant 0 : index
    %c0_13 = arith.constant 0 : index
    %c0_14 = arith.constant 0 : index
    %11 = vector.load %arg4[%c0_12, %c0_13, %c0_14] : memref<3x12x16xbf16, #tpu.memory_space<vmem>>, vector<1x12x16xbf16>
    %12 = vector.shape_cast %11 : vector<1x12x16xbf16> to vector<12x16xbf16>
    %cst_15 = arith.constant dense<0.000000e+00> : vector<240x16xf32>
    %13 = tpu.matmul %10, %12, %cst_15 {dimension_numbers = #tpu.dot_dimension_numbers<[1], [0], [0], [1], [0, 0, 1, 1], [], []>} : vector<240x12xbf16>, vector<12x16xbf16>, vector<240x16xf32> -> vector<240x16xf32>
    %14 = arith.addf %9, %13 : vector<240x16xf32>
    %c16_16 = arith.constant 16 : index
    %c0_17 = arith.constant 0 : index
    %15 = vector.load %arg8[%c16_16, %c0_17] : memref<256x16xf32, #tpu.memory_space<vmem>>, vector<240x16xf32>
    tpu.vector_store %arg8[%c16_16, %c0_17], %14 {strides = array<i32>} : memref<256x16xf32, #tpu.memory_space<vmem>>, vector<240x16xf32>,
    %c0_18 = arith.constant 0 : index
    %c1_19 = arith.constant 1 : index
    %c0_20 = arith.constant 0 : index
    %c0_21 = arith.constant 0 : index
    %16 = vector.load %arg2[%c0_18, %c1_19, %c0_20, %c0_21] : memref<1x16x16x12xbf16, #tpu.memory_space<vmem>>, vector<1x15x16x12xbf16>
    %17 = vector.shape_cast %16 : vector<1x15x16x12xbf16> to vector<15x16x12xbf16>
    %c0_22 = arith.constant 0 : index
    %c0_23 = arith.constant 0 : index
    %18 = vector.load %arg8[%c0_22, %c0_23] : memref<256x16xf32, #tpu.memory_space<vmem>>, vector<240x16xf32>
    %19 = vector.shape_cast %17 : vector<15x16x12xbf16> to vector<240x12xbf16>
    %c2 = arith.constant 2 : index
    %c0_24 = arith.constant 0 : index
    %c0_25 = arith.constant 0 : index
    %20 = vector.load %arg4[%c2, %c0_24, %c0_25] : memref<3x12x16xbf16, #tpu.memory_space<vmem>>, vector<1x12x16xbf16>
    %21 = vector.shape_cast %20 : vector<1x12x16xbf16> to vector<12x16xbf16>
    %cst_26 = arith.constant dense<0.000000e+00> : vector<240x16xf32>
    %22 = tpu.matmul %19, %21, %cst_26 {dimension_numbers = #tpu.dot_dimension_numbers<[1], [0], [0], [1], [0, 0, 1, 1], [], []>} : vector<240x12xbf16>, vector<12x16xbf16>, vector<240x16xf32> -> vector<240x16xf32>
    %23 = arith.addf %18, %22 : vector<240x16xf32>
    %c0_27 = arith.constant 0 : index
    %c0_28 = arith.constant 0 : index
    %24 = vector.load %arg8[%c0_27, %c0_28] : memref<256x16xf32, #tpu.memory_space<vmem>>, vector<240x16xf32>
    tpu.vector_store %arg8[%c0_27, %c0_28], %23 {strides = array<i32>} : memref<256x16xf32, #tpu.memory_space<vmem>>, vector<240x16xf32>,
    %c0_29 = arith.constant 0 : index
    %c0_30 = arith.constant 0 : index
    %25 = vector.load %arg8[%c0_29, %c0_30] : memref<256x16xf32, #tpu.memory_space<vmem>>, vector<16x16xf32>
    %c0_31 = arith.constant 0 : index
    %c0_32 = arith.constant 0 : index
    %c0_33 = arith.constant 0 : index
    %c0_34 = arith.constant 0 : index
    %c0_35 = arith.constant 0 : index
    %26 = vector.load %arg3[%c0_31, %c0_32, %c0_33, %c0_34, %c0_35] : memref<1x1x2x16x12xbf16, #tpu.memory_space<vmem>>, vector<1x1x1x16x12xbf16>
    %27 = vector.shape_cast %26 : vector<1x1x1x16x12xbf16> to vector<16x12xbf16>
    %c0_36 = arith.constant 0 : index
    %c0_37 = arith.constant 0 : index
    %c0_38 = arith.constant 0 : index
    %28 = vector.load %arg4[%c0_36, %c0_37, %c0_38] : memref<3x12x16xbf16, #tpu.memory_space<vmem>>, vector<1x12x16xbf16>
    %29 = vector.shape_cast %28 : vector<1x12x16xbf16> to vector<12x16xbf16>
    %cst_39 = arith.constant dense<0.000000e+00> : vector<16x16xf32>
    %30 = tpu.matmul %27, %29, %cst_39 {dimension_numbers = #tpu.dot_dimension_numbers<[1], [0], [0], [1], [0, 0, 1, 1], [], []>} : vector<16x12xbf16>, vector<12x16xbf16>, vector<16x16xf32> -> vector<16x16xf32>
    %31 = arith.addf %25, %30 : vector<16x16xf32>
    %c0_40 = arith.constant 0 : index
    %c0_41 = arith.constant 0 : index
    %32 = vector.load %arg8[%c0_40, %c0_41] : memref<256x16xf32, #tpu.memory_space<vmem>>, vector<16x16xf32>
    tpu.vector_store %arg8[%c0_40, %c0_41], %31 {strides = array<i32>} : memref<256x16xf32, #tpu.memory_space<vmem>>, vector<16x16xf32>,
    %c240 = arith.constant 240 : index
    %c0_42 = arith.constant 0 : index
    %33 = vector.load %arg8[%c240, %c0_42] : memref<256x16xf32, #tpu.memory_space<vmem>>, vector<16x16xf32>
    %c0_43 = arith.constant 0 : index
    %c0_44 = arith.constant 0 : index
    %c1_45 = arith.constant 1 : index
    %c0_46 = arith.constant 0 : index
    %c0_47 = arith.constant 0 : index
    %34 = vector.load %arg3[%c0_43, %c0_44, %c1_45, %c0_46, %c0_47] : memref<1x1x2x16x12xbf16, #tpu.memory_space<vmem>>, vector<1x1x1x16x12xbf16>
    %35 = vector.shape_cast %34 : vector<1x1x1x16x12xbf16> to vector<16x12xbf16>
    %c2_48 = arith.constant 2 : index
    %c0_49 = arith.constant 0 : index
    %c0_50 = arith.constant 0 : index
    %36 = vector.load %arg4[%c2_48, %c0_49, %c0_50] : memref<3x12x16xbf16, #tpu.memory_space<vmem>>, vector<1x12x16xbf16>
    %37 = vector.shape_cast %36 : vector<1x12x16xbf16> to vector<12x16xbf16>
    %cst_51 = arith.constant dense<0.000000e+00> : vector<16x16xf32>
    %38 = tpu.matmul %35, %37, %cst_51 {dimension_numbers = #tpu.dot_dimension_numbers<[1], [0], [0], [1], [0, 0, 1, 1], [], []>} : vector<16x12xbf16>, vector<12x16xbf16>, vector<16x16xf32> -> vector<16x16xf32>
    %39 = arith.addf %33, %38 : vector<16x16xf32>
    %c240_52 = arith.constant 240 : index
    %c0_53 = arith.constant 0 : index
    %40 = vector.load %arg8[%c240_52, %c0_53] : memref<256x16xf32, #tpu.memory_space<vmem>>, vector<16x16xf32>
    tpu.vector_store %arg8[%c240_52, %c0_53], %39 {strides = array<i32>} : memref<256x16xf32, #tpu.memory_space<vmem>>, vector<16x16xf32>,
    %c0_54 = arith.constant 0 : index
    %c0_55 = arith.constant 0 : index
    %41 = vector.load %arg8[%c0_54, %c0_55] : memref<256x16xf32, #tpu.memory_space<vmem>>, vector<256x16xf32>
    %c0_56 = arith.constant 0 : index
    %c0_57 = arith.constant 0 : index
    %42 = vector.load %arg5[%c0_56, %c0_57] : memref<1x16xf32, #tpu.memory_space<vmem>>, vector<1x16xf32>
    %43 = vector.broadcast %42 : vector<1x16xf32> to vector<256x16xf32>
    %44 = arith.addf %41, %43 : vector<256x16xf32>
    %c0_58 = arith.constant 0 : index
    %c0_59 = arith.constant 0 : index
    %45 = memref.load %arg6[%c0_58, %c0_59] : memref<1x1xf32, #tpu.memory_space<smem>>
    %cst_60 = arith.constant 0.000000e+00 : f32
    %46 = vector.broadcast %cst_60 : f32 to vector<256x16xf32>
    %47 = arith.cmpf oge, %44, %46 : vector<256x16xf32>
    %48 = vector.broadcast %45 : f32 to vector<256x16xf32>
    %49 = arith.mulf %48, %44 : vector<256x16xf32>
    %50 = arith.select %47, %44, %49 : vector<256x16xi1>, vector<256x16xf32>
    %51 = arith.truncf %50 : vector<256x16xf32> to vector<256x16xbf16>
    %c0_61 = arith.constant 0 : index
    %c0_62 = arith.constant 0 : index
    %c0_63 = arith.constant 0 : index
    %c0_64 = arith.constant 0 : index
    %52 = vector.load %arg7[%c0_61, %c0_62, %c0_63, %c0_64] : memref<1x1x256x16xbf16, #tpu.memory_space<vmem>>, vector<1x1x256x16xbf16>
    %53 = vector.shape_cast %52 : vector<1x1x256x16xbf16> to vector<256x16xbf16>
    %54 = vector.shape_cast %51 : vector<256x16xbf16> to vector<1x1x256x16xbf16>
    tpu.vector_store %arg7[%c0_61, %c0_62, %c0_63, %c0_64], %54 {strides = array<i32>} : memref<1x1x256x16xbf16, #tpu.memory_space<vmem>>, vector<1x1x256x16xbf16>,
    return
  }
  func.func @transform_0(%arg0: i32, %arg1: i32) -> (i32, i32, i32, i32) {
    %c0_i32 = arith.constant 0 : i32
    %c0_i32_0 = arith.constant 0 : i32
    %c0_i32_1 = arith.constant 0 : i32
    return %arg0, %arg1, %c0_i32, %c0_i32_0 : i32, i32, i32, i32
  }
  func.func @transform_1(%arg0: i32, %arg1: i32) -> (i32, i32, i32, i32, i32) {
    %c0_i32 = arith.constant 0 : i32
    %c0_i32_0 = arith.constant 0 : i32
    %c0_i32_1 = arith.constant 0 : i32
    %c0_i32_2 = arith.constant 0 : i32
    return %arg0, %arg1, %c0_i32, %c0_i32_0, %c0_i32_1 : i32, i32, i32, i32, i32
  }
  func.func @transform_2(%arg0: i32, %arg1: i32) -> (i32, i32, i32) {
    %c0_i32 = arith.constant 0 : i32
    %c0_i32_0 = arith.constant 0 : i32
    %c0_i32_1 = arith.constant 0 : i32
    %c0_i32_2 = arith.constant 0 : i32
    return %c0_i32, %c0_i32_0, %c0_i32_1 : i32, i32, i32
  }
  func.func @transform_3(%arg0: i32, %arg1: i32) -> (i32, i32) {
    %c0_i32 = arith.constant 0 : i32
    %c0_i32_0 = arith.constant 0 : i32
    %c0_i32_1 = arith.constant 0 : i32
    return %c0_i32, %c0_i32_0 : i32, i32
  }
  func.func @transform_4(%arg0: i32, %arg1: i32) -> (i32, i32) {
    %c0_i32 = arith.constant 0 : i32
    %c0_i32_0 = arith.constant 0 : i32
    %c0_i32_1 = arith.constant 0 : i32
    return %c0_i32, %c0_i32_0 : i32, i32
  }
  func.func @transform_5(%arg0: i32, %arg1: i32) -> (i32, i32, i32, i32) {
    %c0_i32 = arith.constant 0 : i32
    %c0_i32_0 = arith.constant 0 : i32
    %c0_i32_1 = arith.constant 0 : i32
    return %arg0, %arg1, %c0_i32, %c0_i32_0 : i32, i32, i32, i32
  }
}

</mosaic_0001>

<bundles_post_ra>
// kernel: tpu_custom_call.1
= control target key start
LH: loop header
LB: loop body
LE: loop exit
PB: predicated region body
PF: predicated region fallthrough
CT: control target
= control target key end

     0   :  { %s2144_s20 = smov 0   ;;  %s2146_s21 = smov 0   ;;  %s2598_s0 = inlined_call_operand.vmem [shape: bf16[2,16,16,12], index: 0, kind: input, shape index: {}]   ;;  %s2599_s1 = inlined_call_operand.vmem [shape: bf16[2,1,2,16,12], index: 1, kind: input, shape index: {}]   ;;  %s2600_s2 = inlined_call_operand.vmem [shape: bf16[3,12,16], index: 2, kind: input, shape index: {}]   ;;  %s2601_s3 = inlined_call_operand.vmem [shape: f32[1,16], index: 3, kind: input, shape index: {}]   ;;  %s2602_s4 = inlined_call_operand.<no memory space> [shape: f32[1,1], index: 4, kind: input, shape index: {}]   ;;  %s2603_s5 = inlined_call_operand.vmem [shape: bf16[2,1,256,16], index: 5, kind: output, shape index: {}]  }
   0x1   :  { %10 = sst [smem:[#allocation3]] %s2602_s4  ;;  %s2148_s22 = smov 0  }
   0x2 LB: > { %s28_s4 = sadd.s32 1, %s2105_s21  ;;  %p1696_p0 = scmp.ge.s32.totalorder %s2109_s22, 1  ;;  %s2109_s22 = sphi %s2148_s22, %s16_s22   ;;  %s2105_s21 = sphi %s2146_s21, %s2605_s21   ;;  %s2101_s20 = sphi %s2144_s20, %s2604_s20  }
   0x3   : > { %p30_p1 = scmp.ge.s32.totalorder %s28_s4, 2  ;;  %p226_p2 = scmp.lt.s32.totalorder %s2109_s22, 3 }
   0x5   : > { %s2607_s4 = smov (%p30_p1, %s28_s4), 0  ;;  %p227_p3 = pnand %p1696_p0, %p226_p2 }
   0x6   : > { %p273_p4 = scmp.lt.s32.totalorder (!%p227_p3), %s2101_s20, 1  ;;  %s1416_s29 = sld [smem:[#allocation3]] (!%p227_p3) }
   0x7   : > { %230 = sbr.rel (%p227_p3) target bundleno = 367 (0x16f), region = 40 }
   0xc   : > { %v1771_v0 = vld [vmem:[%s2600_s2 + $0x8] sm:$0xf]  ;;  %v2022_v1 = vld [vmem:[%s2600_s2 + $0x8] sm:$0x30]  ;;  %vm471_vm0 = vcmask 1045504   ;;  %s2609_s20 = smov (!%p273_p4, %s2101_s20), 1 }
   0xd   : > { %v1772_v2 = vor.u32 %v2022_v1, %v1771_v0  ;;  %v1851_v3 = vld [vmem:[%s2600_s2] sm:$0xf]  ;;  %v2038_v4 = vld [vmem:[%s2600_s2] sm:$0x30]  ;;  %v1962_v5 = vld [vmem:[%s2600_s2 + $0x10] sm:$0xf] }
   0xe   : > { %v1852_v6 = vor.u32 %v2038_v4, %v1851_v3  ;;  %v2054_v7 = vld [vmem:[%s2600_s2 + $0x10] sm:$0x30]  ;;  %s2003_s10 = sshll.u32 %s2609_s20, 7  ;;  %vm422_vm1 = vcmask 97280   ;;  %v1985_v36 = vld [vmem:[%s2600_s2] sm:$0xf] }
   0xf   : > { %v473_v8 = vsel %vm471_vm0, %v1772_v2, 0  ;;  %v1963_v9 = vor.u32 %v2054_v7, %v1962_v5  ;;  %s2191_s13 = scalar_lea.vmem %s2598_s0, %s2003_s10  ;;  %v2056_v37 = vld [vmem:[%s2600_s2] sm:$0x30]  ;;  %vm564_vm2 = vcmask 130048   ;;  %v1998_v60 = vld [vmem:[%s2600_s2 + $0x10] sm:$0xf]  ;;  %s2342_s9 = scalar_lea.vmem %s2603_s5, %s2003_s10 }
  0x10   : > { %482 = vmatpush.bf16.msra.mxu0 %v473_v8  ;;  %2059 = vmatpush.bf16.msra.mxu3 %v473_v8  ;;  %v785_v10 = vsel %vm471_vm0, %v1852_v6, 0  ;;  %v2006_v12 = vld [vmem:[%s2191_s13] sm:$0xff]  ;;  %v2039_v15 = vld [vmem:[%s2191_s13 + $0x8] sm:$0xff]  ;;  %v2040_v19 = vld [vmem:[%s2191_s13 + $0x10] sm:$0xff]  ;;  %v1986_v38 = vor.u32 %v2056_v37, %v1985_v36  ;;  %s2004_s25 = sshll.u32 %s2609_s20, 4  ;;  %vm1546_vm4 = vcmask 125952  }
  0x11   : > { %794 = vmatpush.bf16.msra.mxu1 %v785_v10  ;;  %v1121_v11 = vsel %vm471_vm0, %v1963_v9, 0  ;;  %v2018_v13 = vld [vmem:[%s2191_s13 + $0x60] sm:$0xff]  ;;  %v2007_v16 = vld [vmem:[%s2191_s13 + $0x8] sm:$0xff]  ;;  %v2008_v20 = vld [vmem:[%s2191_s13 + $0x10] sm:$0xff]  ;;  %s2301_s28 = scalar_lea.vmem %s2599_s1, %s2004_s25 }
  0x12   : > { %1130 = vmatpush.bf16.msra.mxu2 %v1121_v11  ;;  %v2023_v14 = vld [vmem:[%s2191_s13] sm:$0xff]  ;;  %v2019_v17 = vld [vmem:[%s2191_s13 + $0x68] sm:$0xff]  ;;  %v2020_v21 = vld [vmem:[%s2191_s13 + $0x70] sm:$0xff]  ;;  %v1287_v39 = vsel %vm471_vm0, %v1986_v38, 0  ;;  %v2327_v38 = vstv %s1416_s29 }
  0x13   : > { %1773 = vmatmul.msk.bf16.vlgmr.msra.gmra.mxu0 %vm422_vm1, %v2006_v12  ;;  %1785 = vmatmul.msk.bf16.vlgmr.msra.gmra.mxu3 %vm422_vm1, %v2018_v13  ;;  %v2024_v18 = vld [vmem:[%s2191_s13 + $0x8] sm:$0xff]  ;;  %v2025_v22 = vld [vmem:[%s2191_s13 + $0x10] sm:$0xff]  ;;  %v2041_v23 = vld [vmem:[%s2191_s13 + $0x18] sm:$0xff] }
  0x14   : > { %2060 = vmatpush.bf16.msrb.mxu3 %v785_v10  ;;  %1853 = vmatmul.msk.bf16.vlgmr.msra.gmra.mxu1 %vm422_vm1, %v2023_v14  ;;  %v2009_v24 = vld [vmem:[%s2191_s13 + $0x18] sm:$0xff]  ;;  %v2042_v27 = vld [vmem:[%s2191_s13 + $0x20] sm:$0xff]  ;;  %v2043_v31 = vld [vmem:[%s2191_s13 + $0x28] sm:$0xff] }
  0x15   : > { %1964 = vmatmul.msk.bf16.vlgmr.msra.gmra.mxu2 %vm422_vm1, %v2039_v15  ;;  %v2021_v25 = vld [vmem:[%s2191_s13 + $0x78] sm:$0xff]  ;;  %v2010_v28 = vld [vmem:[%s2191_s13 + $0x20] sm:$0xff]  ;;  %v2011_v32 = vld [vmem:[%s2191_s13 + $0x28] sm:$0xff] }
  0x16   : > { %v2026_v26 = vld [vmem:[%s2191_s13 + $0x18] sm:$0xff]  ;;  %v2035_v29 = vld [vmem:[%s2191_s13 + $0x60] sm:$0xff]  ;;  %v2036_v33 = vld [vmem:[%s2191_s13 + $0x68] sm:$0xff] }
  0x17   : > { %v2027_v30 = vld [vmem:[%s2191_s13 + $0x20] sm:$0xff]  ;;  %v2028_v34 = vld [vmem:[%s2191_s13 + $0x28] sm:$0xff]  ;;  %v2044_v35 = vld [vmem:[%s2191_s13 + $0x30] sm:$0xff] }
  0x18   : > { %2061 = vmatpush.bf16.msra.mxu3 %v1121_v11  ;;  %v2012_v40 = vld [vmem:[%s2191_s13 + $0x30] sm:$0xff]  ;;  %v2045_v43 = vld [vmem:[%s2191_s13 + $0x38] sm:$0xff]  ;;  %v2051_v45 = vld [vmem:[%s2191_s13 + $0x68] sm:$0xff] }
  0x19   : > { %v2037_v41 = vld [vmem:[%s2191_s13 + $0x70] sm:$0xff]  ;;  %v2013_v44 = vld [vmem:[%s2191_s13 + $0x38] sm:$0xff]  ;;  %v2046_v47 = vld [vmem:[%s2191_s13 + $0x40] sm:$0xff] }
  0x1a   : > { %v2029_v42 = vld [vmem:[%s2191_s13 + $0x30] sm:$0xff]  ;;  %v2030_v46 = vld [vmem:[%s2191_s13 + $0x38] sm:$0xff]  ;;  %v2014_v48 = vld [vmem:[%s2191_s13 + $0x40] sm:$0xff] }
  0x1b   : > { %v2052_v49 = vld [vmem:[%s2191_s13 + $0x70] sm:$0xff]  ;;  %v2031_v51 = vld [vmem:[%s2191_s13 + $0x40] sm:$0xff]  ;;  %v2047_v52 = vld [vmem:[%s2191_s13 + $0x48] sm:$0xff] }
  0x1c   : > { %v2058_v61 = vld [vmem:[%s2600_s2 + $0x10] sm:$0x30]  ;;  %v2015_v1 = vld [vmem:[%s2191_s13 + $0x48] sm:$0xff]  ;;  %v2053_v2 = vld [vmem:[%s2191_s13 + $0x78] sm:$0xff] }
  0x1d   : > { %v1999_v63 = vor.u32 %v2058_v61, %v1998_v60  ;;  %v2032_v5 = vld [vmem:[%s2191_s13 + $0x48] sm:$0xff]  ;;  %v2048_v6 = vld [vmem:[%s2191_s13 + $0x50] sm:$0xff] }
  0x1f   : > { %v1328_v7 = vsel %vm471_vm0, %v1999_v63, 0 }
  0x23   : > { %1774 = vmatmul.msk.bf16.gmra.mxu0 %vm422_vm1, %v2007_v16  ;;  %1786 = vmatmul.msk.bf16.gmra.mxu3 %vm422_vm1, %v2019_v17 }
  0x24   : > { %1854 = vmatmul.msk.bf16.gmra.mxu1 %vm422_vm1, %v2024_v18  ;;  %v2016_v18 = vld [vmem:[%s2191_s13 + $0x50] sm:$0xff] }
  0x25   : > { %1965 = vmatmul.msk.bf16.gmra.mxu2 %vm422_vm1, %v2040_v19  ;;  %v2055_v19 = vld [vmem:[%s2301_s28] sm:$0xff] }
  0x33   : > { %1775 = vmatmul.msk.bf16.gmra.mxu0 %vm422_vm1, %v2008_v20  ;;  %1787 = vmatmul.msk.bf16.gmra.mxu3 %vm422_vm1, %v2020_v21 }
  0x34   : > { %1855 = vmatmul.msk.bf16.gmra.mxu1 %vm422_vm1, %v2025_v22  ;;  %v2033_v22 = vld [vmem:[%s2191_s13 + $0x50] sm:$0xff] }
  0x35   : > { %1966 = vmatmul.msk.bf16.gmra.mxu2 %vm422_vm1, %v2041_v23  ;;  %v2049_v23 = vld [vmem:[%s2191_s13 + $0x58] sm:$0xff] }
  0x43   : > { %1776 = vmatmul.msk.bf16.gmra.mxu0 %vm422_vm1, %v2009_v24  ;;  %1788 = vmatmul.msk.bf16.gmra.mxu3 %vm422_vm1, %v2021_v25 }
  0x44   : > { %1856 = vmatmul.msk.bf16.gmra.mxu1 %vm422_vm1, %v2026_v26 }
  0x45   : > { %1967 = vmatmul.msk.bf16.gmra.mxu2 %vm422_vm1, %v2042_v27 }
  0x53   : > { %1777 = vmatmul.msk.bf16.gmra.mxu0 %vm422_vm1, %v2010_v28  ;;  %1865 = vmatmul.msk.bf16.vlgmr.msrb.gmra.mxu3 %vm422_vm1, %v2035_v29 }
  0x54   : > { %1857 = vmatmul.msk.bf16.gmra.mxu1 %vm422_vm1, %v2027_v30  ;;  %1296 = vmatpush.bf16.msrb.mxu3 %v1287_v39 }
  0x55   : > { %1968 = vmatmul.msk.bf16.gmra.mxu2 %vm422_vm1, %v2043_v31 }
  0x63   : > { %1778 = vmatmul.msk.bf16.gmra.mxu0 %vm422_vm1, %v2011_v32  ;;  %1866 = vmatmul.msk.bf16.gmra.mxu3 %vm422_vm1, %v2036_v33  ;;  %v2321_v32 = vld [vmem:[%s2601_s3] ss:$0 sm:$0xff] }
  0x64   : > { %1858 = vmatmul.msk.bf16.gmra.mxu1 %vm422_vm1, %v2028_v34 }
  0x65   : > { %1969 = vmatmul.msk.bf16.gmra.mxu2 %vm422_vm1, %v2044_v35 }
  0x73   : > { %1779 = vmatmul.msk.bf16.gmra.mxu0 %vm422_vm1, %v2012_v40  ;;  %1867 = vmatmul.msk.bf16.gmra.mxu3 %vm422_vm1, %v2037_v41 }
  0x74   : > { %1859 = vmatmul.msk.bf16.gmra.mxu1 %vm422_vm1, %v2029_v42 }
  0x75   : > { %1970 = vmatmul.msk.bf16.gmra.mxu2 %vm422_vm1, %v2045_v43  ;;  %v2017_v43 = vld [vmem:[%s2191_s13 + $0x58] sm:$0xff] }
  0x83   : > { %1780 = vmatmul.msk.bf16.gmra.mxu0 %vm422_vm1, %v2013_v44  ;;  %1976 = vmatmul.msk.bf16.vlgmr.msra.gmra.mxu3 %vm422_vm1, %v2051_v45  ;;  %v2057_v44 = vld [vmem:[%s2301_s28 + $0x8] sm:$0xff] }
  0x84   : > { %1860 = vmatmul.msk.bf16.gmra.mxu1 %vm422_vm1, %v2030_v46  ;;  %1337 = vmatpush.bf16.msra.mxu3 %v1328_v7 }
  0x85   : > { %1971 = vmatmul.msk.bf16.gmra.mxu2 %vm422_vm1, %v2046_v47  ;;  %v2034_v47 = vld [vmem:[%s2191_s13 + $0x58] sm:$0xff] }
  0x90   : > { %v484_v50 = vpop.f32.mrf.mxu0 }
  0x91   : > { %565 = vst.msk [vmem:[#allocation2] sm:$0xff] %vm564_vm2, %v484_v50  ;;  %v796_v53 = vpop.f32.mrf.mxu1 }
  0x93   : > { %1781 = vmatmul.msk.bf16.gmra.mxu0 %vm422_vm1, %v2014_v48  ;;  %1977 = vmatmul.msk.bf16.gmra.mxu3 %vm422_vm1, %v2052_v49  ;;  %v2050_v48 = vld [vmem:[%s2191_s13 + $0x60] sm:$0xff] }
  0x94   : > { %1861 = vmatmul.msk.bf16.gmra.mxu1 %vm422_vm1, %v2031_v51 }
  0x95   : > { %1972 = vmatmul.msk.bf16.gmra.mxu2 %vm422_vm1, %v2047_v52 }
  0x96   : > { %v544_v54 = vpop.f32.mrf.mxu3 }
  0x97   : > { %589 = vst.msk [vmem:[#allocation2 + $0xc0] sm:$0xff] %vm564_vm2, %v544_v54 }
  0x98   : > { %v1132_v55 = vpop.f32.mrf.mxu2  ;;  %v486_v56 = vpop.f32.mrf.mxu0  ;;  %v962_v57 = vld [vmem:[#allocation2] sm:$0xff] }
  0x99   : > { %566 = vst.msk [vmem:[#allocation2 + $0x8] sm:$0xff] %vm564_vm2, %v486_v56  ;;  %v798_v58 = vpop.f32.mrf.mxu1  ;;  %v1207_v59 = vadd.f32 %v1132_v55, %v962_v57 }
  0x9b   : > { %1237 = vst.msk [vmem:[#allocation2] sm:$0xff] %vm564_vm2, %v1207_v59 }
  0x9e   : > { %v546_v62 = vpop.f32.mrf.mxu3 }
  0x9f   : > { %590 = vst.msk [vmem:[#allocation2 + $0xc8] sm:$0xff] %vm564_vm2, %v546_v62 }
  0xa0   : > { %v1134_v0 = vpop.f32.mrf.mxu2  ;;  %v489_v3 = vpop.f32.mrf.mxu0  ;;  %v963_v4 = vld [vmem:[#allocation2 + $0x8] sm:$0xff] }
  0xa1   : > { %567 = vst.msk [vmem:[#allocation2 + $0x10] sm:$0xff] %vm564_vm2, %v489_v3  ;;  %v801_v8 = vpop.f32.mrf.mxu1  ;;  %v1208_v9 = vadd.f32 %v1134_v0, %v963_v4 }
  0xa3   : > { %1238 = vst.msk [vmem:[#allocation2 + $0x8] sm:$0xff] %vm564_vm2, %v1208_v9  ;;  %1782 = vmatmul.msk.bf16.gmra.mxu0 %vm422_vm1, %v2015_v1  ;;  %1978 = vmatmul.msk.bf16.gmra.mxu3 %vm422_vm1, %v2053_v2 }
  0xa4   : > { %1862 = vmatmul.msk.bf16.gmra.mxu1 %vm422_vm1, %v2032_v5 }
  0xa5   : > { %1973 = vmatmul.msk.bf16.gmra.mxu2 %vm422_vm1, %v2048_v6 }
  0xa6   : > { %v549_v10 = vpop.f32.mrf.mxu3 }
  0xa7   : > { %591 = vst.msk [vmem:[#allocation2 + $0xd0] sm:$0xff] %vm564_vm2, %v549_v10 }
  0xa8   : > { %v1137_v11 = vpop.f32.mrf.mxu2  ;;  %v627_v12 = vld [vmem:[#allocation2 + $0x10] sm:$0xff]  ;;  %v491_v13 = vpop.f32.mrf.mxu0 }
  0xa9   : > { %v871_v14 = vadd.f32 %v796_v53, %v627_v12  ;;  %568 = vst.msk [vmem:[#allocation2 + $0x18] sm:$0xff] %vm564_vm2, %v491_v13  ;;  %v803_v15 = vpop.f32.mrf.mxu1 }
  0xab   : > { %901 = vst.msk [vmem:[#allocation2 + $0x10] sm:$0xff] %vm564_vm2, %v871_v14 }
  0xae   : > { %v551_v16 = vpop.f32.mrf.mxu3 }
  0xaf   : > { %592 = vst.msk [vmem:[#allocation2 + $0xd8] sm:$0xff] %vm564_vm2, %v551_v16 }
  0xb0   : > { %v1139_v17 = vpop.f32.mrf.mxu2  ;;  %v628_v20 = vld [vmem:[#allocation2 + $0x18] sm:$0xff]  ;;  %v494_v21 = vpop.f32.mrf.mxu0 }
  0xb1   : > { %v872_v24 = vadd.f32 %v798_v58, %v628_v20  ;;  %569 = vst.msk [vmem:[#allocation2 + $0x20] sm:$0xff] %vm564_vm2, %v494_v21  ;;  %v2309_v25 = vpop.f32.mrf.mxu1 }
  0xb2   : > { %v964_v26 = vld [vmem:[#allocation2 + $0x10] sm:$0xff] }
  0xb3   : > { %902 = vst.msk [vmem:[#allocation2 + $0x18] sm:$0xff] %vm564_vm2, %v872_v24  ;;  %v1209_v27 = vadd.f32 %v1137_v11, %v964_v26  ;;  %1783 = vmatmul.msk.bf16.gmra.mxu0 %vm422_vm1, %v2016_v18  ;;  %1987 = vmatmul.msk.bf16.vlgmr.msrb.gmra.mxu3 %vm422_vm1, %v2055_v19  ;;  %v651_v19 = vld [vmem:[#allocation2 + $0xd0] sm:$0xff] }
  0xb4   : > { %1863 = vmatmul.msk.bf16.gmra.mxu1 %vm422_vm1, %v2033_v22 }
  0xb5   : > { %1974 = vmatmul.msk.bf16.gmra.mxu2 %vm422_vm1, %v2049_v23  ;;  %1239 = vst.msk [vmem:[#allocation2 + $0x10] sm:$0xff] %vm564_vm2, %v1209_v27 }
  0xb6   : > { %v554_v28 = vpop.f32.mrf.mxu3 }
  0xb7   : > { %593 = vst.msk [vmem:[#allocation2 + $0xe0] sm:$0xff] %vm564_vm2, %v554_v28 }
  0xb8   : > { %v1142_v29 = vpop.f32.mrf.mxu2  ;;  %v629_v30 = vld [vmem:[#allocation2 + $0x20] sm:$0xff]  ;;  %v496_v31 = vpop.f32.mrf.mxu0 }
  0xb9   : > { %v873_v33 = vadd.f32 %v801_v8, %v629_v30  ;;  %570 = vst.msk [vmem:[#allocation2 + $0x28] sm:$0xff] %vm564_vm2, %v496_v31  ;;  %v2324_v34 = vpop.f32.mrf.mxu1 }
  0xba   : > { %v965_v35 = vld [vmem:[#allocation2 + $0x18] sm:$0xff] }
  0xbb   : > { %903 = vst.msk [vmem:[#allocation2 + $0x20] sm:$0xff] %vm564_vm2, %v873_v33  ;;  %v1210_v36 = vadd.f32 %v1139_v17, %v965_v35  ;;  %v652_v35 = vld [vmem:[#allocation2 + $0xd8] sm:$0xff] }
  0xbc   : > { %v1350_v37 = vld [vmem:[#allocation2 + $0x10] sm:$0xff] }
  0xbd   : > { %v1386_v39 = vadd.f32 %v2321_v32, %v1350_v37  ;;  %1240 = vst.msk [vmem:[#allocation2 + $0x18] sm:$0xff] %vm564_vm2, %v1210_v36 }
  0xbe   : > { %v556_v40 = vpop.f32.mrf.mxu3 }
  0xbf   : > { %vm1419_vm3 = vcmp.ge.f32.partialorder %v1386_v39, 0.0  ;;  %v1452_v41 = vmul.f32 %v2327_v38, %v1386_v39  ;;  %594 = vst.msk [vmem:[#allocation2 + $0xe8] sm:$0xff] %vm564_vm2, %v556_v40 }
  0xc0   : > { %v1144_v42 = vpop.f32.mrf.mxu2  ;;  %v630_v45 = vld [vmem:[#allocation2 + $0x28] sm:$0xff]  ;;  %v499_v46 = vpop.f32.mrf.mxu0 }
  0xc1   : > { %v1484_v49 = vsel %vm1419_vm3, %v1386_v39, %v1452_v41  ;;  %v874_v50 = vadd.f32 %v803_v15, %v630_v45  ;;  %571 = vst.msk [vmem:[#allocation2 + $0x30] sm:$0xff] %vm564_vm2, %v499_v46  ;;  %v811_v51 = vpop.f32.mrf.mxu1 }
  0xc2   : > { %v1516_v52 = vpack.c.bf16 %v1484_v49, %v1484_v49  ;;  %v966_v53 = vld [vmem:[#allocation2 + $0x20] sm:$0xff] }
  0xc3   : > { %904 = vst.msk [vmem:[#allocation2 + $0x28] sm:$0xff] %vm564_vm2, %v874_v50  ;;  %v1211_v54 = vadd.f32 %v1142_v29, %v966_v53  ;;  %1784 = vmatmul.msk.bf16.gmra.mxu0 %vm422_vm1, %v2017_v43  ;;  %2000 = vmatmul.msk.bf16.vlgmr.msra.gmra.mxu3 %vm422_vm1, %v2057_v44 }
  0xc4   : > { %1549 = vst.msk [vmem:[%s2342_s9 + $0x8] sm:$0xf] %vm1546_vm4, %v1516_v52  ;;  %v1351_v55 = vld [vmem:[#allocation2 + $0x18] sm:$0xff]  ;;  %1864 = vmatmul.msk.bf16.gmra.mxu1 %vm422_vm1, %v2034_v47 }
  0xc5   : > { %1975 = vmatmul.msk.bf16.gmra.mxu2 %vm422_vm1, %v2050_v48  ;;  %v1387_v56 = vadd.f32 %v2321_v32, %v1351_v55  ;;  %1241 = vst.msk [vmem:[#allocation2 + $0x20] sm:$0xff] %vm564_vm2, %v1211_v54 }
  0xc6   : > { %v559_v57 = vpop.f32.mrf.mxu3 }
  0xc7   : > { %vm1420_vm5 = vcmp.ge.f32.partialorder %v1387_v56, 0.0  ;;  %v1453_v58 = vmul.f32 %v2327_v38, %v1387_v56  ;;  %595 = vst.msk [vmem:[#allocation2 + $0xf0] sm:$0xff] %vm564_vm2, %v559_v57 }
  0xc8   : > { %v1147_v59 = vpop.f32.mrf.mxu2  ;;  %v631_v60 = vld [vmem:[#allocation2 + $0x30] sm:$0xff]  ;;  %v501_v61 = vpop.f32.mrf.mxu0 }
  0xc9   : > { %v1485_v62 = vsel %vm1420_vm5, %v1387_v56, %v1453_v58  ;;  %v875_v63 = vadd.f32 %v2309_v25, %v631_v60  ;;  %572 = vst.msk [vmem:[#allocation2 + $0x38] sm:$0xff] %vm564_vm2, %v501_v61  ;;  %v813_v0 = vpop.f32.mrf.mxu1 }
  0xca   : > { %v1517_v1 = vpack.c.bf16 %v1485_v62, %v1485_v62  ;;  %v967_v2 = vld [vmem:[#allocation2 + $0x28] sm:$0xff] }
  0xcb   : > { %905 = vst.msk [vmem:[#allocation2 + $0x30] sm:$0xff] %vm564_vm2, %v875_v63  ;;  %v1212_v3 = vadd.f32 %v1144_v42, %v967_v2  ;;  %v654_v2 = vld [vmem:[#allocation2 + $0xe8] sm:$0xff] }
  0xcc   : > { %1550 = vst.msk [vmem:[%s2342_s9 + $0xc] sm:$0xf] %vm1546_vm4, %v1517_v1  ;;  %v1352_v4 = vld [vmem:[#allocation2 + $0x20] sm:$0xff] }
  0xcd   : > { %v1388_v5 = vadd.f32 %v2321_v32, %v1352_v4  ;;  %1242 = vst.msk [vmem:[#allocation2 + $0x28] sm:$0xff] %vm564_vm2, %v1212_v3 }
  0xce   : > { %v561_v6 = vpop.f32.mrf.mxu3 }
  0xcf   : > { %vm1421_vm6 = vcmp.ge.f32.partialorder %v1388_v5, 0.0  ;;  %v1454_v7 = vmul.f32 %v2327_v38, %v1388_v5  ;;  %596 = vst.msk [vmem:[#allocation2 + $0xf8] sm:$0xff] %vm564_vm2, %v561_v6 }
  0xd0   : > { %v1149_v8 = vpop.f32.mrf.mxu2  ;;  %v632_v9 = vld [vmem:[#allocation2 + $0x38] sm:$0xff]  ;;  %v504_v10 = vpop.f32.mrf.mxu0 }
  0xd1   : > { %v1486_v11 = vsel %vm1421_vm6, %v1388_v5, %v1454_v7  ;;  %v876_v12 = vadd.f32 %v2324_v34, %v632_v9  ;;  %573 = vst.msk [vmem:[#allocation2 + $0x40] sm:$0xff] %vm564_vm2, %v504_v10  ;;  %v2367_v13 = vpop.f32.mrf.mxu1 }
  0xd2   : > { %v1518_v14 = vpack.c.bf16 %v1486_v11, %v1486_v11  ;;  %v968_v15 = vld [vmem:[#allocation2 + $0x30] sm:$0xff] }
  0xd3   : > { %906 = vst.msk [vmem:[#allocation2 + $0x38] sm:$0xff] %vm564_vm2, %v876_v12  ;;  %v1213_v16 = vadd.f32 %v1147_v59, %v968_v15 }
  0xd4   : > { %1551 = vst.msk [vmem:[%s2342_s9 + $0x10] sm:$0xf] %vm1546_vm4, %v1518_v14  ;;  %v1353_v17 = vld [vmem:[#allocation2 + $0x28] sm:$0xff] }
  0xd5   : > { %v1389_v18 = vadd.f32 %v2321_v32, %v1353_v17  ;;  %1243 = vst.msk [vmem:[#allocation2 + $0x30] sm:$0xff] %vm564_vm2, %v1213_v16  ;;  %v655_v16 = vld [vmem:[#allocation2 + $0xf0] sm:$0xff] }
  0xd6   : > { %v856_v20 = vpop.f32.mrf.mxu3 }
  0xd7   : > { %vm1422_vm7 = vcmp.ge.f32.partialorder %v1389_v18, 0.0  ;;  %v1455_v21 = vmul.f32 %v2327_v38, %v1389_v18  ;;  %v895_v22 = vadd.f32 %v856_v20, %v651_v19 }
  0xd8   : > { %v1152_v23 = vpop.f32.mrf.mxu2  ;;  %v633_v24 = vld [vmem:[#allocation2 + $0x40] sm:$0xff]  ;;  %v506_v25 = vpop.f32.mrf.mxu0 }
  0xd9   : > { %v1487_v26 = vsel %vm1422_vm7, %v1389_v18, %v1455_v21  ;;  %v877_v27 = vadd.f32 %v811_v51, %v633_v24  ;;  %925 = vst.msk [vmem:[#allocation2 + $0xd0] sm:$0xff] %vm564_vm2, %v895_v22  ;;  %v2376_v28 = vpop.f32.mrf.mxu1  ;;  %v653_v51 = vld [vmem:[#allocation2 + $0xe0] sm:$0xff] }
  0xda   : > { %v1519_v29 = vpack.c.bf16 %v1487_v26, %v1487_v26  ;;  %v969_v30 = vld [vmem:[#allocation2 + $0x38] sm:$0xff]  ;;  %574 = vst.msk [vmem:[#allocation2 + $0x48] sm:$0xff] %vm564_vm2, %v506_v25 }
  0xdb   : > { %907 = vst.msk [vmem:[#allocation2 + $0x40] sm:$0xff] %vm564_vm2, %v877_v27  ;;  %v1214_v31 = vadd.f32 %v1149_v8, %v969_v30 }
  0xdc   : > { %1552 = vst.msk [vmem:[%s2342_s9 + $0x14] sm:$0xf] %vm1546_vm4, %v1519_v29  ;;  %v1354_v33 = vld [vmem:[#allocation2 + $0x30] sm:$0xff] }
  0xdd   : > { %v1390_v34 = vadd.f32 %v2321_v32, %v1354_v33  ;;  %1244 = vst.msk [vmem:[#allocation2 + $0x38] sm:$0xff] %vm564_vm2, %v1214_v31  ;;  %v656_v31 = vld [vmem:[#allocation2 + $0xf8] sm:$0xff] }
  0xde   : > { %v858_v36 = vpop.f32.mrf.mxu3 }
  0xdf   : > { %vm1423_vm8 = vcmp.ge.f32.partialorder %v1390_v34, 0.0  ;;  %v1456_v37 = vmul.f32 %v2327_v38, %v1390_v34  ;;  %v896_v39 = vadd.f32 %v858_v36, %v652_v35 }
  0xe0   : > { %v1154_v40 = vpop.f32.mrf.mxu2  ;;  %v509_v41 = vpop.f32.mrf.mxu0 }
  0xe1   : > { %v1488_v42 = vsel %vm1423_vm8, %v1390_v34, %v1456_v37  ;;  %v634_v43 = vld [vmem:[#allocation2 + $0x48] sm:$0xff]  ;;  %926 = vst.msk [vmem:[#allocation2 + $0xd8] sm:$0xff] %vm564_vm2, %v896_v39  ;;  %v2386_v44 = vpop.f32.mrf.mxu1 }
  0xe2   : > { %v1520_v45 = vpack.c.bf16 %v1488_v42, %v1488_v42  ;;  %v878_v46 = vadd.f32 %v813_v0, %v634_v43  ;;  %v970_v47 = vld [vmem:[#allocation2 + $0x40] sm:$0xff]  ;;  %575 = vst.msk [vmem:[#allocation2 + $0x50] sm:$0xff] %vm564_vm2, %v509_v41 }
  0xe3   : > { %v1215_v48 = vadd.f32 %v1152_v23, %v970_v47 }
  0xe4   : > { %1553 = vst.msk [vmem:[%s2342_s9 + $0x18] sm:$0xf] %vm1546_vm4, %v1520_v45  ;;  %v1355_v49 = vld [vmem:[#allocation2 + $0x38] sm:$0xff] }
  0xe5   : > { %v1391_v50 = vadd.f32 %v2321_v32, %v1355_v49  ;;  %908 = vst.msk [vmem:[#allocation2 + $0x48] sm:$0xff] %vm564_vm2, %v878_v46 }
  0xe6   : > { %1245 = vst.msk [vmem:[#allocation2 + $0x40] sm:$0xff] %vm564_vm2, %v1215_v48  ;;  %v861_v52 = vpop.f32.mrf.mxu3 }
  0xe7   : > { %vm1424_vm9 = vcmp.ge.f32.partialorder %v1391_v50, 0.0  ;;  %v1457_v53 = vmul.f32 %v2327_v38, %v1391_v50  ;;  %v897_v54 = vadd.f32 %v861_v52, %v653_v51 }
  0xe8   : > { %v1157_v55 = vpop.f32.mrf.mxu2  ;;  %v511_v56 = vpop.f32.mrf.mxu0 }
  0xe9   : > { %v1489_v57 = vsel %vm1424_vm9, %v1391_v50, %v1457_v53  ;;  %v635_v58 = vld [vmem:[#allocation2 + $0x50] sm:$0xff]  ;;  %927 = vst.msk [vmem:[#allocation2 + $0xe0] sm:$0xff] %vm564_vm2, %v897_v54  ;;  %v2396_v59 = vpop.f32.mrf.mxu1 }
  0xea   : > { %v1521_v60 = vpack.c.bf16 %v1489_v57, %v1489_v57  ;;  %v879_v61 = vadd.f32 %v2367_v13, %v635_v58  ;;  %576 = vst.msk [vmem:[#allocation2 + $0x58] sm:$0xff] %vm564_vm2, %v511_v56 }
  0xec   : > { %1554 = vst.msk [vmem:[%s2342_s9 + $0x1c] sm:$0xf] %vm1546_vm4, %v1521_v60  ;;  %v971_v62 = vld [vmem:[#allocation2 + $0x48] sm:$0xff] }
  0xed   : > { %v1356_v63 = vld [vmem:[#allocation2 + $0x40] sm:$0xff]  ;;  %909 = vst.msk [vmem:[#allocation2 + $0x50] sm:$0xff] %vm564_vm2, %v879_v61  ;;  %v1216_v0 = vadd.f32 %v1154_v40, %v971_v62 }
  0xee   : > { %v1392_v1 = vadd.f32 %v2321_v32, %v1356_v63  ;;  %v863_v3 = vpop.f32.mrf.mxu3 }
  0xef   : > { %1246 = vst.msk [vmem:[#allocation2 + $0x48] sm:$0xff] %vm564_vm2, %v1216_v0  ;;  %v898_v4 = vadd.f32 %v863_v3, %v654_v2 }
  0xf0   : > { %v1159_v5 = vpop.f32.mrf.mxu2  ;;  %vm1425_vm10 = vcmp.ge.f32.partialorder %v1392_v1, 0.0  ;;  %v1458_v6 = vmul.f32 %v2327_v38, %v1392_v1  ;;  %v514_v7 = vpop.f32.mrf.mxu0 }
  0xf1   : > { %v636_v8 = vld [vmem:[#allocation2 + $0x58] sm:$0xff]  ;;  %928 = vst.msk [vmem:[#allocation2 + $0xe8] sm:$0xff] %vm564_vm2, %v898_v4  ;;  %v826_v9 = vpop.f32.mrf.mxu1 }
  0xf2   : > { %v1490_v10 = vsel %vm1425_vm10, %v1392_v1, %v1458_v6  ;;  %v880_v11 = vadd.f32 %v2376_v28, %v636_v8  ;;  %577 = vst.msk [vmem:[#allocation2 + $0x60] sm:$0xff] %vm564_vm2, %v514_v7 }
  0xf3   : > { %v1522_v12 = vpack.c.bf16 %v1490_v10, %v1490_v10  ;;  %v988_v10 = vld [vmem:[#allocation2 + $0xd0] sm:$0xff] }
  0xf4   : > { %910 = vst.msk [vmem:[#allocation2 + $0x58] sm:$0xff] %vm564_vm2, %v880_v11  ;;  %v972_v13 = vld [vmem:[#allocation2 + $0x50] sm:$0xff] }
  0xf5   : > { %1555 = vst.msk [vmem:[%s2342_s9 + $0x20] sm:$0xf] %vm1546_vm4, %v1522_v12  ;;  %v1217_v14 = vadd.f32 %v1157_v55, %v972_v13 }
  0xf6   : > { %v1357_v15 = vld [vmem:[#allocation2 + $0x48] sm:$0xff]  ;;  %v866_v17 = vpop.f32.mrf.mxu3 }
  0xf7   : > { %v1393_v18 = vadd.f32 %v2321_v32, %v1357_v15  ;;  %1247 = vst.msk [vmem:[#allocation2 + $0x50] sm:$0xff] %vm564_vm2, %v1217_v14  ;;  %v899_v19 = vadd.f32 %v866_v17, %v655_v16 }
  0xf8   : > { %v1162_v20 = vpop.f32.mrf.mxu2  ;;  %v516_v21 = vpop.f32.mrf.mxu0 }
  0xf9   : > { %vm1426_vm11 = vcmp.ge.f32.partialorder %v1393_v18, 0.0  ;;  %v1459_v22 = vmul.f32 %v2327_v38, %v1393_v18  ;;  %v637_v23 = vld [vmem:[#allocation2 + $0x60] sm:$0xff]  ;;  %929 = vst.msk [vmem:[#allocation2 + $0xf0] sm:$0xff] %vm564_vm2, %v899_v19  ;;  %v828_v24 = vpop.f32.mrf.mxu1 }
  0xfa   : > { %v881_v25 = vadd.f32 %v2386_v44, %v637_v23  ;;  %578 = vst.msk [vmem:[#allocation2 + $0x68] sm:$0xff] %vm564_vm2, %v516_v21 }
  0xfb   : > { %v1491_v26 = vsel %vm1426_vm11, %v1393_v18, %v1459_v22  ;;  %v973_v27 = vld [vmem:[#allocation2 + $0x58] sm:$0xff] }
  0xfc   : > { %v1523_v28 = vpack.c.bf16 %v1491_v26, %v1491_v26  ;;  %911 = vst.msk [vmem:[#allocation2 + $0x60] sm:$0xff] %vm564_vm2, %v881_v25  ;;  %v1218_v29 = vadd.f32 %v1159_v5, %v973_v27  ;;  %v989_v25 = vld [vmem:[#allocation2 + $0xd8] sm:$0xff] }
  0xfe   : > { %1556 = vst.msk [vmem:[%s2342_s9 + $0x24] sm:$0xf] %vm1546_vm4, %v1523_v28  ;;  %v1358_v30 = vld [vmem:[#allocation2 + $0x50] sm:$0xff]  ;;  %v868_v33 = vpop.f32.mrf.mxu3 }
  0xff   : > { %v1394_v34 = vadd.f32 %v2321_v32, %v1358_v30  ;;  %1248 = vst.msk [vmem:[#allocation2 + $0x58] sm:$0xff] %vm564_vm2, %v1218_v29  ;;  %v900_v35 = vadd.f32 %v868_v33, %v656_v31 }
 0x100   : > { %v1164_v36 = vpop.f32.mrf.mxu2  ;;  %v519_v37 = vpop.f32.mrf.mxu0 }
 0x101   : > { %vm1427_vm12 = vcmp.ge.f32.partialorder %v1394_v34, 0.0  ;;  %v1460_v39 = vmul.f32 %v2327_v38, %v1394_v34  ;;  %v638_v40 = vld [vmem:[#allocation2 + $0x68] sm:$0xff]  ;;  %930 = vst.msk [vmem:[#allocation2 + $0xf8] sm:$0xff] %vm564_vm2, %v900_v35  ;;  %v831_v41 = vpop.f32.mrf.mxu1 }
 0x102   : > { %v882_v42 = vadd.f32 %v2396_v59, %v638_v40  ;;  %579 = vst.msk [vmem:[#allocation2 + $0x70] sm:$0xff] %vm564_vm2, %v519_v37 }
 0x103   : > { %v1492_v43 = vsel %vm1427_vm12, %v1394_v34, %v1460_v39  ;;  %v974_v44 = vld [vmem:[#allocation2 + $0x60] sm:$0xff] }
 0x104   : > { %v1524_v45 = vpack.c.bf16 %v1492_v43, %v1492_v43  ;;  %912 = vst.msk [vmem:[#allocation2 + $0x68] sm:$0xff] %vm564_vm2, %v882_v42  ;;  %v1219_v46 = vadd.f32 %v1162_v20, %v974_v44 }
 0x106   : > { %1557 = vst.msk [vmem:[%s2342_s9 + $0x28] sm:$0xf] %vm1546_vm4, %v1524_v45  ;;  %v1359_v47 = vld [vmem:[#allocation2 + $0x58] sm:$0xff]  ;;  %v2430_v48 = vpop.f32.mrf.mxu3 }
 0x107   : > { %v1395_v49 = vadd.f32 %v2321_v32, %v1359_v47  ;;  %1249 = vst.msk [vmem:[#allocation2 + $0x60] sm:$0xff] %vm564_vm2, %v1219_v46 }
 0x108   : > { %v1167_v50 = vpop.f32.mrf.mxu2  ;;  %v521_v51 = vpop.f32.mrf.mxu0 }
 0x109   : > { %vm1428_vm13 = vcmp.ge.f32.partialorder %v1395_v49, 0.0  ;;  %v1461_v52 = vmul.f32 %v2327_v38, %v1395_v49  ;;  %v639_v53 = vld [vmem:[#allocation2 + $0x70] sm:$0xff]  ;;  %580 = vst.msk [vmem:[#allocation2 + $0x78] sm:$0xff] %vm564_vm2, %v521_v51  ;;  %v833_v54 = vpop.f32.mrf.mxu1 }
 0x10a   : > { %v883_v55 = vadd.f32 %v826_v9, %v639_v53 }
 0x10b   : > { %v1493_v56 = vsel %vm1428_vm13, %v1395_v49, %v1461_v52  ;;  %v975_v57 = vld [vmem:[#allocation2 + $0x68] sm:$0xff]  ;;  %v990_v49 = vld [vmem:[#allocation2 + $0xe0] sm:$0xff] }
 0x10c   : > { %v1525_v58 = vpack.c.bf16 %v1493_v56, %v1493_v56  ;;  %913 = vst.msk [vmem:[#allocation2 + $0x70] sm:$0xff] %vm564_vm2, %v883_v55  ;;  %v1220_v59 = vadd.f32 %v1164_v36, %v975_v57 }
 0x10e   : > { %1558 = vst.msk [vmem:[%s2342_s9 + $0x2c] sm:$0xf] %vm1546_vm4, %v1525_v58  ;;  %v1360_v60 = vld [vmem:[#allocation2 + $0x60] sm:$0xff]  ;;  %v2439_v61 = vpop.f32.mrf.mxu3 }
 0x10f   : > { %v1396_v62 = vadd.f32 %v2321_v32, %v1360_v60  ;;  %1250 = vst.msk [vmem:[#allocation2 + $0x68] sm:$0xff] %vm564_vm2, %v1220_v59 }
 0x110   : > { %v1169_v63 = vpop.f32.mrf.mxu2  ;;  %v640_v0 = vld [vmem:[#allocation2 + $0x78] sm:$0xff]  ;;  %v524_v1 = vpop.f32.mrf.mxu0 }
 0x111   : > { %vm1429_vm14 = vcmp.ge.f32.partialorder %v1396_v62, 0.0  ;;  %v1462_v2 = vmul.f32 %v2327_v38, %v1396_v62  ;;  %v884_v3 = vadd.f32 %v828_v24, %v640_v0  ;;  %581 = vst.msk [vmem:[#allocation2 + $0x80] sm:$0xff] %vm564_vm2, %v524_v1  ;;  %v2445_v4 = vpop.f32.mrf.mxu1 }
 0x113   : > { %v1494_v5 = vsel %vm1429_vm14, %v1396_v62, %v1462_v2  ;;  %914 = vst.msk [vmem:[#allocation2 + $0x78] sm:$0xff] %vm564_vm2, %v884_v3  ;;  %v976_v6 = vld [vmem:[#allocation2 + $0x70] sm:$0xff] }
 0x114   : > { %v1526_v7 = vpack.c.bf16 %v1494_v5, %v1494_v5  ;;  %v1221_v8 = vadd.f32 %v1167_v50, %v976_v6 }
 0x116   : > { %1559 = vst.msk [vmem:[%s2342_s9 + $0x30] sm:$0xf] %vm1546_vm4, %v1526_v7  ;;  %v1361_v9 = vld [vmem:[#allocation2 + $0x68] sm:$0xff]  ;;  %v1197_v11 = vpop.f32.mrf.mxu3 }
 0x117   : > { %v1397_v12 = vadd.f32 %v2321_v32, %v1361_v9  ;;  %1251 = vst.msk [vmem:[#allocation2 + $0x70] sm:$0xff] %vm564_vm2, %v1221_v8  ;;  %v1233_v13 = vadd.f32 %v1197_v11, %v988_v10 }
 0x118   : > { %v1172_v14 = vpop.f32.mrf.mxu2  ;;  %v641_v15 = vld [vmem:[#allocation2 + $0x80] sm:$0xff]  ;;  %v526_v16 = vpop.f32.mrf.mxu0 }
 0x119   : > { %vm1430_vm15 = vcmp.ge.f32.partialorder %v1397_v12, 0.0  ;;  %v1463_v17 = vmul.f32 %v2327_v38, %v1397_v12  ;;  %v885_v18 = vadd.f32 %v831_v41, %v641_v15  ;;  %1263 = vst.msk [vmem:[#allocation2 + $0xd0] sm:$0xff] %vm564_vm2, %v1233_v13  ;;  %v2454_v19 = vpop.f32.mrf.mxu1 }
 0x11a   : > { %v977_v20 = vld [vmem:[#allocation2 + $0x78] sm:$0xff]  ;;  %582 = vst.msk [vmem:[#allocation2 + $0x88] sm:$0xff] %vm564_vm2, %v526_v16 }
 0x11b   : > { %v1495_v21 = vsel %vm1430_vm15, %v1397_v12, %v1463_v17  ;;  %915 = vst.msk [vmem:[#allocation2 + $0x80] sm:$0xff] %vm564_vm2, %v885_v18  ;;  %v1222_v22 = vadd.f32 %v1169_v63, %v977_v20 }
 0x11c   : > { %v1527_v23 = vpack.c.bf16 %v1495_v21, %v1495_v21 }
 0x11d   : > { %1252 = vst.msk [vmem:[#allocation2 + $0x78] sm:$0xff] %vm564_vm2, %v1222_v22 }
 0x11e   : > { %1560 = vst.msk [vmem:[%s2342_s9 + $0x34] sm:$0xf] %vm1546_vm4, %v1527_v23  ;;  %v1362_v24 = vld [vmem:[#allocation2 + $0x70] sm:$0xff]  ;;  %v1199_v26 = vpop.f32.mrf.mxu3 }
 0x11f   : > { %v1398_v27 = vadd.f32 %v2321_v32, %v1362_v24  ;;  %v1234_v28 = vadd.f32 %v1199_v26, %v989_v25 }
 0x120   : > { %v1174_v29 = vpop.f32.mrf.mxu2  ;;  %v1374_v30 = vld [vmem:[#allocation2 + $0xd0] sm:$0xff]  ;;  %v529_v31 = vpop.f32.mrf.mxu0 }
 0x121   : > { %vm1431_vm0 = vcmp.ge.f32.partialorder %v1398_v27, 0.0  ;;  %v1464_v33 = vmul.f32 %v2327_v38, %v1398_v27  ;;  %v1410_v34 = vadd.f32 %v2321_v32, %v1374_v30  ;;  %v642_v35 = vld [vmem:[#allocation2 + $0x88] sm:$0xff]  ;;  %1264 = vst.msk [vmem:[#allocation2 + $0xd8] sm:$0xff] %vm564_vm2, %v1234_v28  ;;  %v2465_v36 = vpop.f32.mrf.mxu1 }
 0x122   : > { %v886_v37 = vadd.f32 %v833_v54, %v642_v35  ;;  %v978_v39 = vld [vmem:[#allocation2 + $0x80] sm:$0xff]  ;;  %583 = vst.msk [vmem:[#allocation2 + $0x90] sm:$0xff] %vm564_vm2, %v529_v31 }
 0x123   : > { %v1496_v40 = vsel %vm1431_vm0, %v1398_v27, %v1464_v33  ;;  %vm1443_vm1 = vcmp.ge.f32.partialorder %v1410_v34, 0.0  ;;  %v1476_v41 = vmul.f32 %v2327_v38, %v1410_v34  ;;  %v1223_v42 = vadd.f32 %v1172_v14, %v978_v39  ;;  %v1267_v27 = vld [vmem:[#allocation2] sm:$0xff] }
 0x124   : > { %v1528_v43 = vpack.c.bf16 %v1496_v40, %v1496_v40  ;;  %v1363_v44 = vld [vmem:[#allocation2 + $0x78] sm:$0xff]  ;;  %916 = vst.msk [vmem:[#allocation2 + $0x88] sm:$0xff] %vm564_vm2, %v886_v37 }
 0x125   : > { %v1399_v45 = vadd.f32 %v2321_v32, %v1363_v44  ;;  %v1508_v46 = vsel %vm1443_vm1, %v1410_v34, %v1476_v41  ;;  %1253 = vst.msk [vmem:[#allocation2 + $0x80] sm:$0xff] %vm564_vm2, %v1223_v42 }
 0x126   : > { %1561 = vst.msk [vmem:[%s2342_s9 + $0x38] sm:$0xf] %vm1546_vm4, %v1528_v43  ;;  %v1540_v47 = vpack.c.bf16 %v1508_v46, %v1508_v46  ;;  %v1202_v50 = vpop.f32.mrf.mxu3 }
 0x127   : > { %vm1432_vm3 = vcmp.ge.f32.partialorder %v1399_v45, 0.0  ;;  %v1465_v51 = vmul.f32 %v2327_v38, %v1399_v45  ;;  %v1235_v52 = vadd.f32 %v1202_v50, %v990_v49  ;;  %v1268_v49 = vld [vmem:[#allocation2 + $0x8] sm:$0xff] }
 0x128   : > { %1573 = vst.msk [vmem:[%s2342_s9 + $0x68] sm:$0xf] %vm1546_vm4, %v1540_v47  ;;  %v1375_v53 = vld [vmem:[#allocation2 + $0xd8] sm:$0xff]  ;;  %v531_v54 = vpop.f32.mrf.mxu0  ;;  %v1177_v59 = vpop.f32.mrf.mxu2 }
 0x129   : > { %v1497_v55 = vsel %vm1432_vm3, %v1399_v45, %v1465_v51  ;;  %v1411_v56 = vadd.f32 %v2321_v32, %v1375_v53  ;;  %v643_v57 = vld [vmem:[#allocation2 + $0x90] sm:$0xff]  ;;  %1265 = vst.msk [vmem:[#allocation2 + $0xe0] sm:$0xff] %vm564_vm2, %v1235_v52  ;;  %v2479_v58 = vpop.f32.mrf.mxu1 }
 0x12a   : > { %v1529_v60 = vpack.c.bf16 %v1497_v55, %v1497_v55  ;;  %v887_v62 = vadd.f32 %v2445_v4, %v643_v57  ;;  %584 = vst.msk [vmem:[#allocation2 + $0x98] sm:$0xff] %vm564_vm2, %v531_v54  ;;  %v991_v4 = vld [vmem:[#allocation2 + $0xe8] sm:$0xff]  ;;  %v649_v57 = vld [vmem:[#allocation2 + $0xc0] sm:$0xff] }
 0x12b   : > { %vm1444_vm5 = vcmp.ge.f32.partialorder %v1411_v56, 0.0  ;;  %v1477_v63 = vmul.f32 %v2327_v38, %v1411_v56  ;;  %v979_v0 = vld [vmem:[#allocation2 + $0x88] sm:$0xff] }
 0x12c   : > { %1562 = vst.msk [vmem:[%s2342_s9 + $0x3c] sm:$0xf] %vm1546_vm4, %v1529_v60  ;;  %v1364_v1 = vld [vmem:[#allocation2 + $0x80] sm:$0xff]  ;;  %v1224_v2 = vadd.f32 %v1174_v29, %v979_v0 }
 0x12d   : > { %v1400_v3 = vadd.f32 %v2321_v32, %v1364_v1  ;;  %v1509_v5 = vsel %vm1444_vm5, %v1411_v56, %v1477_v63  ;;  %917 = vst.msk [vmem:[#allocation2 + $0x90] sm:$0xff] %vm564_vm2, %v887_v62 }
 0x12e   : > { %v1541_v6 = vpack.c.bf16 %v1509_v5, %v1509_v5  ;;  %1254 = vst.msk [vmem:[#allocation2 + $0x88] sm:$0xff] %vm564_vm2, %v1224_v2  ;;  %v1204_v7 = vpop.f32.mrf.mxu3 }
 0x12f   : > { %vm1433_vm6 = vcmp.ge.f32.partialorder %v1400_v3, 0.0  ;;  %v1466_v8 = vmul.f32 %v2327_v38, %v1400_v3  ;;  %v1236_v9 = vadd.f32 %v1204_v7, %v991_v4  ;;  %v1307_v4 = vld [vmem:[#allocation2 + $0xf0] sm:$0xff] }
 0x130   : > { %1574 = vst.msk [vmem:[%s2342_s9 + $0x6c] sm:$0xf] %vm1546_vm4, %v1541_v6  ;;  %v1376_v10 = vld [vmem:[#allocation2 + $0xe0] sm:$0xff]  ;;  %v534_v11 = vpop.f32.mrf.mxu0  ;;  %v1179_v20 = vpop.f32.mrf.mxu2 }
 0x131   : > { %v1498_v12 = vsel %vm1433_vm6, %v1400_v3, %v1466_v8  ;;  %v1412_v13 = vadd.f32 %v2321_v32, %v1376_v10  ;;  %v644_v14 = vld [vmem:[#allocation2 + $0x98] sm:$0xff]  ;;  %1266 = vst.msk [vmem:[#allocation2 + $0xe8] sm:$0xff] %vm564_vm2, %v1236_v9  ;;  %v2494_v15 = vpop.f32.mrf.mxu1 }
 0x132   : > { %v1530_v16 = vpack.c.bf16 %v1498_v12, %v1498_v12  ;;  %v888_v17 = vadd.f32 %v2454_v19, %v644_v14  ;;  %585 = vst.msk [vmem:[#allocation2 + $0xa0] sm:$0xff] %vm564_vm2, %v534_v11 }
 0x133   : > { %vm1445_vm7 = vcmp.ge.f32.partialorder %v1412_v13, 0.0  ;;  %v1478_v18 = vmul.f32 %v2327_v38, %v1412_v13 }
 0x134   : > { %1563 = vst.msk [vmem:[%s2342_s9 + $0x40] sm:$0xf] %vm1546_vm4, %v1530_v16  ;;  %v980_v21 = vld [vmem:[#allocation2 + $0x90] sm:$0xff] }
 0x135   : > { %v1365_v22 = vld [vmem:[#allocation2 + $0x88] sm:$0xff]  ;;  %v1510_v23 = vsel %vm1445_vm7, %v1412_v13, %v1478_v18  ;;  %918 = vst.msk [vmem:[#allocation2 + $0x98] sm:$0xff] %vm564_vm2, %v888_v17  ;;  %v1225_v24 = vadd.f32 %v1177_v59, %v980_v21 }
 0x136   : > { %v1401_v25 = vadd.f32 %v2321_v32, %v1365_v22  ;;  %v1542_v26 = vpack.c.bf16 %v1510_v23, %v1510_v23  ;;  %v1298_v19 = vpop.f32.mrf.mxu3  ;;  %v650_v17 = vld [vmem:[#allocation2 + $0xc8] sm:$0xff] }
 0x137   : > { %1255 = vst.msk [vmem:[#allocation2 + $0x90] sm:$0xff] %vm564_vm2, %v1225_v24  ;;  %v1303_v28 = vadd.f32 %v1298_v19, %v1267_v27 }
 0x138   : > { %vm1434_vm8 = vcmp.ge.f32.partialorder %v1401_v25, 0.0  ;;  %v1467_v29 = vmul.f32 %v2327_v38, %v1401_v25  ;;  %1575 = vst.msk [vmem:[%s2342_s9 + $0x70] sm:$0xf] %vm1546_vm4, %v1542_v26  ;;  %v1377_v30 = vld [vmem:[#allocation2 + $0xe8] sm:$0xff]  ;;  %v536_v31 = vpop.f32.mrf.mxu0  ;;  %v1182_v45 = vpop.f32.mrf.mxu2 }
 0x139   : > { %v1413_v33 = vadd.f32 %v2321_v32, %v1377_v30  ;;  %v645_v34 = vld [vmem:[#allocation2 + $0xa0] sm:$0xff]  ;;  %1305 = vst.msk [vmem:[#allocation2] sm:$0xff] %vm564_vm2, %v1303_v28  ;;  %v2509_v35 = vpop.f32.mrf.mxu1  ;;  %v1308_v30 = vld [vmem:[#allocation2 + $0xf8] sm:$0xff] }
 0x13a   : > { %v1499_v37 = vsel %vm1434_vm8, %v1401_v25, %v1467_v29  ;;  %v889_v39 = vadd.f32 %v2465_v36, %v645_v34  ;;  %586 = vst.msk [vmem:[#allocation2 + $0xa8] sm:$0xff] %vm564_vm2, %v536_v31 }
 0x13b   : > { %v1531_v40 = vpack.c.bf16 %v1499_v37, %v1499_v37  ;;  %vm1446_vm9 = vcmp.ge.f32.partialorder %v1413_v33, 0.0  ;;  %v1479_v41 = vmul.f32 %v2327_v38, %v1413_v33 }
 0x13c   : > { %919 = vst.msk [vmem:[#allocation2 + $0xa0] sm:$0xff] %vm564_vm2, %v889_v39  ;;  %v981_v42 = vld [vmem:[#allocation2 + $0x98] sm:$0xff] }
 0x13d   : > { %1564 = vst.msk [vmem:[%s2342_s9 + $0x44] sm:$0xf] %vm1546_vm4, %v1531_v40  ;;  %v1511_v43 = vsel %vm1446_vm9, %v1413_v33, %v1479_v41  ;;  %v1226_v44 = vadd.f32 %v1179_v20, %v981_v42 }
 0x13e   : > { %v1366_v46 = vld [vmem:[#allocation2 + $0x90] sm:$0xff]  ;;  %v1543_v47 = vpack.c.bf16 %v1511_v43, %v1511_v43  ;;  %v1300_v50 = vpop.f32.mrf.mxu3 }
 0x13f   : > { %v1402_v36 = vadd.f32 %v2321_v32, %v1366_v46  ;;  %1256 = vst.msk [vmem:[#allocation2 + $0x98] sm:$0xff] %vm564_vm2, %v1226_v44  ;;  %v1304_v51 = vadd.f32 %v1300_v50, %v1268_v49 }
 0x140   : > { %1576 = vst.msk [vmem:[%s2342_s9 + $0x74] sm:$0xf] %vm1546_vm4, %v1543_v47  ;;  %v1348_v52 = vld [vmem:[#allocation2] sm:$0xff]  ;;  %v539_v53 = vpop.f32.mrf.mxu0  ;;  %v1184_v9 = vpop.f32.mrf.mxu2 }
 0x141   : > { %vm1435_vm10 = vcmp.ge.f32.partialorder %v1402_v36, 0.0  ;;  %v1468_v54 = vmul.f32 %v2327_v38, %v1402_v36  ;;  %v1384_v55 = vadd.f32 %v2321_v32, %v1348_v52  ;;  %v646_v56 = vld [vmem:[#allocation2 + $0xa8] sm:$0xff]  ;;  %1306 = vst.msk [vmem:[#allocation2 + $0x8] sm:$0xff] %vm564_vm2, %v1304_v51  ;;  %v851_v59 = vpop.f32.mrf.mxu1 }
 0x142   : > { %v890_v60 = vadd.f32 %v2479_v58, %v646_v56  ;;  %587 = vst.msk [vmem:[#allocation2 + $0xb0] sm:$0xff] %vm564_vm2, %v539_v53  ;;  %v893_v62 = vadd.f32 %v851_v59, %v649_v57 }
 0x143   : > { %v1500_v63 = vsel %vm1435_vm10, %v1402_v36, %v1468_v54  ;;  %vm1417_vm11 = vcmp.ge.f32.partialorder %v1384_v55, 0.0  ;;  %v1450_v0 = vmul.f32 %v2327_v38, %v1384_v55  ;;  %v982_v1 = vld [vmem:[#allocation2 + $0xa0] sm:$0xff] }
 0x144   : > { %v1532_v2 = vpack.c.bf16 %v1500_v63, %v1500_v63  ;;  %920 = vst.msk [vmem:[#allocation2 + $0xa8] sm:$0xff] %vm564_vm2, %v890_v60  ;;  %v1227_v3 = vadd.f32 %v1182_v45, %v982_v1 }
 0x145   : > { %v1482_v5 = vsel %vm1417_vm11, %v1384_v55, %v1450_v0  ;;  %923 = vst.msk [vmem:[#allocation2 + $0xc0] sm:$0xff] %vm564_vm2, %v893_v62 }
 0x146   : > { %1565 = vst.msk [vmem:[%s2342_s9 + $0x48] sm:$0xf] %vm1546_vm4, %v1532_v2  ;;  %v1367_v6 = vld [vmem:[#allocation2 + $0x98] sm:$0xff]  ;;  %v1514_v58 = vpack.c.bf16 %v1482_v5, %v1482_v5  ;;  %v1339_v7 = vpop.f32.mrf.mxu3 }
 0x147   : > { %v1403_v8 = vadd.f32 %v2321_v32, %v1367_v6  ;;  %1257 = vst.msk [vmem:[#allocation2 + $0xa0] sm:$0xff] %vm564_vm2, %v1227_v3  ;;  %v1344_v10 = vadd.f32 %v1339_v7, %v1307_v4 }
 0x148   : > { %1547 = vst.msk [vmem:[%s2342_s9] sm:$0xf] %vm1546_vm4, %v1514_v58  ;;  %v1349_v11 = vld [vmem:[#allocation2 + $0x8] sm:$0xff]  ;;  %v541_v12 = vpop.f32.mrf.mxu0  ;;  %v1187_v41 = vpop.f32.mrf.mxu2 }
 0x149   : > { %vm1436_vm12 = vcmp.ge.f32.partialorder %v1403_v8, 0.0  ;;  %v1469_v13 = vmul.f32 %v2327_v38, %v1403_v8  ;;  %v1385_v14 = vadd.f32 %v2321_v32, %v1349_v11  ;;  %v647_v16 = vld [vmem:[#allocation2 + $0xb0] sm:$0xff]  ;;  %1346 = vst.msk [vmem:[#allocation2 + $0xf0] sm:$0xff] %vm564_vm2, %v1344_v10  ;;  %v853_v18 = vpop.f32.mrf.mxu1 }
 0x14a   : > { %v891_v20 = vadd.f32 %v2494_v15, %v647_v16  ;;  %588 = vst.msk [vmem:[#allocation2 + $0xb8] sm:$0xff] %vm564_vm2, %v541_v12  ;;  %v894_v21 = vadd.f32 %v853_v18, %v650_v17 }
 0x14b   : > { %v1501_v22 = vsel %vm1436_vm12, %v1403_v8, %v1469_v13  ;;  %vm1418_vm13 = vcmp.ge.f32.partialorder %v1385_v14, 0.0  ;;  %v1451_v23 = vmul.f32 %v2327_v38, %v1385_v14  ;;  %v983_v24 = vld [vmem:[#allocation2 + $0xa8] sm:$0xff] }
 0x14c   : > { %v1533_v25 = vpack.c.bf16 %v1501_v22, %v1501_v22  ;;  %921 = vst.msk [vmem:[#allocation2 + $0xb0] sm:$0xff] %vm564_vm2, %v891_v20  ;;  %v986_v26 = vld [vmem:[#allocation2 + $0xc0] sm:$0xff]  ;;  %v1228_v28 = vadd.f32 %v1184_v9, %v983_v24 }
 0x14d   : > { %v1483_v27 = vsel %vm1418_vm13, %v1385_v14, %v1451_v23  ;;  %v1231_v19 = vadd.f32 %v2430_v48, %v986_v26  ;;  %924 = vst.msk [vmem:[#allocation2 + $0xc8] sm:$0xff] %vm564_vm2, %v894_v21 }
 0x14e   : > { %1566 = vst.msk [vmem:[%s2342_s9 + $0x4c] sm:$0xf] %vm1546_vm4, %v1533_v25  ;;  %v1368_v15 = vld [vmem:[#allocation2 + $0xa0] sm:$0xff]  ;;  %v1515_v29 = vpack.c.bf16 %v1483_v27, %v1483_v27  ;;  %v1341_v31 = vpop.f32.mrf.mxu3 }
 0x14f   : > { %v1404_v33 = vadd.f32 %v2321_v32, %v1368_v15  ;;  %1261 = vst.msk [vmem:[#allocation2 + $0xc0] sm:$0xff] %vm564_vm2, %v1231_v19  ;;  %v1345_v34 = vadd.f32 %v1341_v31, %v1308_v30 }
 0x150   : > { %1548 = vst.msk [vmem:[%s2342_s9 + $0x4] sm:$0xf] %vm1546_vm4, %v1515_v29  ;;  %v1378_v37 = vld [vmem:[#allocation2 + $0xf0] sm:$0xff]  ;;  %v1189_v62 = vpop.f32.mrf.mxu2 }
 0x151   : > { %vm1437_vm14 = vcmp.ge.f32.partialorder %v1404_v33, 0.0  ;;  %v1470_v48 = vmul.f32 %v2327_v38, %v1404_v33  ;;  %1258 = vst.msk [vmem:[#allocation2 + $0xa8] sm:$0xff] %vm564_vm2, %v1228_v28  ;;  %v1414_v39 = vadd.f32 %v2321_v32, %v1378_v37  ;;  %v648_v40 = vld [vmem:[#allocation2 + $0xb8] sm:$0xff] }
 0x152   : > { %v892_v42 = vadd.f32 %v2509_v35, %v648_v40  ;;  %1347 = vst.msk [vmem:[#allocation2 + $0xf8] sm:$0xff] %vm564_vm2, %v1345_v34 }
 0x153   : > { %v1502_v43 = vsel %vm1437_vm14, %v1404_v33, %v1470_v48  ;;  %vm1447_vm15 = vcmp.ge.f32.partialorder %v1414_v39, 0.0  ;;  %v1480_v44 = vmul.f32 %v2327_v38, %v1414_v39  ;;  %v984_v45 = vld [vmem:[#allocation2 + $0xb0] sm:$0xff] }
 0x154   : > { %v1534_v46 = vpack.c.bf16 %v1502_v43, %v1502_v43  ;;  %922 = vst.msk [vmem:[#allocation2 + $0xb8] sm:$0xff] %vm564_vm2, %v892_v42  ;;  %v987_v47 = vld [vmem:[#allocation2 + $0xc8] sm:$0xff]  ;;  %v1229_v36 = vadd.f32 %v1187_v41, %v984_v45 }
 0x155   : > { %v1512_v49 = vsel %vm1447_vm15, %v1414_v39, %v1480_v44  ;;  %v1232_v50 = vadd.f32 %v2439_v61, %v987_v47 }
 0x156   : > { %1567 = vst.msk [vmem:[%s2342_s9 + $0x50] sm:$0xf] %vm1546_vm4, %v1534_v46  ;;  %v1372_v51 = vld [vmem:[#allocation2 + $0xc0] sm:$0xff]  ;;  %v1544_v35 = vpack.c.bf16 %v1512_v49, %v1512_v49 }
 0x157   : > { %v1408_v52 = vadd.f32 %v2321_v32, %v1372_v51  ;;  %1262 = vst.msk [vmem:[#allocation2 + $0xc8] sm:$0xff] %vm564_vm2, %v1232_v50 }
 0x158   : > { %v1369_v53 = vld [vmem:[#allocation2 + $0xa8] sm:$0xff]  ;;  %1577 = vst.msk [vmem:[%s2342_s9 + $0x78] sm:$0xf] %vm1546_vm4, %v1544_v35 }
 0x159   : > { %vm1441_vm0 = vcmp.ge.f32.partialorder %v1408_v52, 0.0  ;;  %v1474_v54 = vmul.f32 %v2327_v38, %v1408_v52  ;;  %v1405_v55 = vadd.f32 %v2321_v32, %v1369_v53  ;;  %1259 = vst.msk [vmem:[#allocation2 + $0xb0] sm:$0xff] %vm564_vm2, %v1229_v36  ;;  %v1379_v61 = vld [vmem:[#allocation2 + $0xf8] sm:$0xff] }
 0x15a   : > { %v1415_v56 = vadd.f32 %v2321_v32, %v1379_v61 }
 0x15b   : > { %v1506_v57 = vsel %vm1441_vm0, %v1408_v52, %v1474_v54  ;;  %vm1438_vm1 = vcmp.ge.f32.partialorder %v1405_v55, 0.0  ;;  %v1471_v59 = vmul.f32 %v2327_v38, %v1405_v55  ;;  %v985_v60 = vld [vmem:[#allocation2 + $0xb8] sm:$0xff] }
 0x15c   : > { %v1538_v63 = vpack.c.bf16 %v1506_v57, %v1506_v57  ;;  %vm1448_vm3 = vcmp.ge.f32.partialorder %v1415_v56, 0.0  ;;  %v1481_v0 = vmul.f32 %v2327_v38, %v1415_v56  ;;  %v1230_v1 = vadd.f32 %v1189_v62, %v985_v60 }
 0x15d   : > { %v1503_v2 = vsel %vm1438_vm1, %v1405_v55, %v1471_v59 }
 0x15e   : > { %1571 = vst.msk [vmem:[%s2342_s9 + $0x60] sm:$0xf] %vm1546_vm4, %v1538_v63  ;;  %v1535_v3 = vpack.c.bf16 %v1503_v2, %v1503_v2  ;;  %v1373_v5 = vld [vmem:[#allocation2 + $0xc8] sm:$0xff]  ;;  %v1513_v6 = vsel %vm1448_vm3, %v1415_v56, %v1481_v0 }
 0x15f   : > { %v1409_v58 = vadd.f32 %v2321_v32, %v1373_v5  ;;  %v1545_v4 = vpack.c.bf16 %v1513_v6, %v1513_v6  ;;  %1260 = vst.msk [vmem:[#allocation2 + $0xb8] sm:$0xff] %vm564_vm2, %v1230_v1 }
 0x160   : > { %1568 = vst.msk [vmem:[%s2342_s9 + $0x54] sm:$0xf] %vm1546_vm4, %v1535_v3  ;;  %v1370_v7 = vld [vmem:[#allocation2 + $0xb0] sm:$0xff] }
 0x161   : > { %vm1442_vm5 = vcmp.ge.f32.partialorder %v1409_v58, 0.0  ;;  %v1475_v8 = vmul.f32 %v2327_v38, %v1409_v58  ;;  %v1406_v9 = vadd.f32 %v2321_v32, %v1370_v7  ;;  %1578 = vst.msk [vmem:[%s2342_s9 + $0x7c] sm:$0xf] %vm1546_vm4, %v1545_v4 }
 0x163   : > { %v1507_v10 = vsel %vm1442_vm5, %v1409_v58, %v1475_v8  ;;  %vm1439_vm6 = vcmp.ge.f32.partialorder %v1406_v9, 0.0  ;;  %v1472_v11 = vmul.f32 %v2327_v38, %v1406_v9 }
 0x164   : > { %v1539_v12 = vpack.c.bf16 %v1507_v10, %v1507_v10 }
 0x165   : > { %v1504_v13 = vsel %vm1439_vm6, %v1406_v9, %v1472_v11 }
 0x166   : > { %1572 = vst.msk [vmem:[%s2342_s9 + $0x64] sm:$0xf] %vm1546_vm4, %v1539_v12  ;;  %v1536_v14 = vpack.c.bf16 %v1504_v13, %v1504_v13  ;;  %v1371_v16 = vld [vmem:[#allocation2 + $0xb8] sm:$0xff] }
 0x167   : > { %v1407_v17 = vadd.f32 %v2321_v32, %v1371_v16 }
 0x168   : > { %1569 = vst.msk [vmem:[%s2342_s9 + $0x58] sm:$0xf] %vm1546_vm4, %v1536_v14 }
 0x169   : > { %vm1440_vm2 = vcmp.ge.f32.partialorder %v1407_v17, 0.0  ;;  %v1473_v18 = vmul.f32 %v2327_v38, %v1407_v17 }
 0x16b   : > { %v1505_v20 = vsel %vm1440_vm2, %v1407_v17, %v1473_v18 }
 0x16c   : > { %v1537_v21 = vpack.c.bf16 %v1505_v20, %v1505_v20 }
 0x16e   : > { %1570 = vst.msk [vmem:[%s2342_s9 + $0x5c] sm:$0xf] %vm1546_vm4, %v1537_v21 }
 0x16f PF: > { %s16_s22 = sadd.s32 1, %s2109_s22   ;;  %s2604_s20 = smov %s2105_s21 }
 0x170   : > { %p13_p5 = scmp.ge.s32.totalorder %s16_s22, 4   ;;  %s2605_s21 = smov %s2607_s4 }
 0x172   :  { %15 = sbr.rel (!%p13_p5) target bundleno = 2 (0x2), region = 77 }

</bundles_post_ra>
